<compile_context>
chip_gen: v6e
topology: v6e:2x2x1
jax: 0.10.0
libtpu: 0.0.40
codegen_flags: <defaults>
</compile_context>

<pallas_src>
import functools

import numpy as np
import jax
import jax.numpy as jnp
from jax import lax
from jax.experimental import pallas as pl
from jax.experimental.pallas import tpu as pltpu

BN_EPS = 1e-5
_VMEM_LIMIT = 64 * 1024 * 1024


# ---------------------------------------------------------------------------
# Kernels
# ---------------------------------------------------------------------------
def _conv_mm_stats_kernel(w_ref, p_ref, y_ref, sum_ref, ssq_ref):
    """One M-tile of y = W @ patches plus per-tile per-channel sum / sumsq."""
    y = jnp.dot(w_ref[...], p_ref[...], preferred_element_type=jnp.float32)
    y_ref[...] = y
    # partial batch statistics for the following (training-mode) BatchNorm
    sum_ref[...] = jnp.sum(y, axis=1, keepdims=True)[None]       # (1, C, 1)
    ssq_ref[...] = jnp.sum(y * y, axis=1, keepdims=True)[None]   # (1, C, 1)


def _bn_act_kernel(y_ref, sum_ref, ssq_ref, gamma_ref, beta_ref, o_ref, *,
                   inv_count, eps, relu):
    """Finalize BN batch stats from per-tile partials, normalize (+ ReLU)."""
    s = jnp.sum(sum_ref[...], axis=0)                             # (C, 1)
    q = jnp.sum(ssq_ref[...], axis=0)                             # (C, 1)
    mean = s * inv_count
    # single-pass E[x^2] - E[x]^2 is fine at these magnitudes; switch to a
    # Welford-style accumulation if tolerances ever tighten.
    var = q * inv_count - mean * mean
    inv_std = lax.rsqrt(var + eps)
    scale = gamma_ref[...] * inv_std                              # (C, 1)
    shift = beta_ref[...] - mean * scale
    out = y_ref[...] * scale + shift                              # (C, TM)
    if relu:
        out = jnp.maximum(out, 0.0)
    o_ref[...] = out


def _maxpool3x3s2_kernel(ee_ref, eo_ref, oe_ref, oo_ref, o_ref, *, ho, wo):
    """MaxPool2d(3, stride=2, padding=1) on an (H, W, N*C) layout.

    Inputs are the even/odd (row, col) planes of the -inf-padded feature map,
    so the stride-2 window gather reduces to unit-stride slices + max
    (N*C sits on the lane axis)."""
    ee = ee_ref[...]
    eo = eo_ref[...]
    oe = oe_ref[...]
    oo = oo_ref[...]
    m = ee[:ho, :wo]
    m = jnp.maximum(m, eo[:ho, :wo])
    m = jnp.maximum(m, ee[:ho, 1:wo + 1])
    m = jnp.maximum(m, oe[:ho, :wo])
    m = jnp.maximum(m, oo[:ho, :wo])
    m = jnp.maximum(m, oe[:ho, 1:wo + 1])
    m = jnp.maximum(m, ee[1:ho + 1, :wo])
    m = jnp.maximum(m, eo[1:ho + 1, :wo])
    m = jnp.maximum(m, ee[1:ho + 1, 1:wo + 1])
    o_ref[...] = m


def _net_stage_kernel(w2_ref, p_ref, b2_ref, w3_ref, b3_ref,
                      gamma_ref, beta_ref, o_ref, *, eps):
    """Fused net stage: Conv2d(64,64,3,s2,p1) -> Conv2d(64,64,1) -> BN2."""
    y2 = jnp.dot(w2_ref[...], p_ref[...],
                 preferred_element_type=jnp.float32) + b2_ref[...]    # (C, M)
    y3 = jnp.dot(w3_ref[...], y2,
                 preferred_element_type=jnp.float32) + b3_ref[...]    # (C, M)
    mean = jnp.mean(y3, axis=1, keepdims=True)                        # (C, 1)
    var = jnp.mean((y3 - mean) * (y3 - mean), axis=1, keepdims=True)
    inv_std = lax.rsqrt(var + eps)
    scale = gamma_ref[...] * inv_std
    shift = beta_ref[...] - mean * scale
    o_ref[...] = y3 * scale + shift


# ---------------------------------------------------------------------------
# Wrapper (JAX glue: patch extraction, layout plumbing)
# ---------------------------------------------------------------------------
def _patches_cm(x, ksize, stride, pad):
    """im2col patches with channel-major (c, kh, kw) K axis, shaped (K, N*Ho*Wo)
    with row order m = n*Ho*Wo + oh*Wo + ow. Single XLA op, no Python loops."""
    n = x.shape[0]
    p = lax.conv_general_dilated_patches(
        x, (ksize, ksize), (stride, stride), [(pad, pad), (pad, pad)],
        dimension_numbers=("NCHW", "OIHW", "NCHW"),
        precision=lax.Precision.HIGHEST)
    _, k, ho, wo = p.shape
    pt = p.reshape(n, k, ho * wo).transpose(1, 0, 2).reshape(k, n * ho * wo)
    return pt.astype(jnp.float32), ho, wo


def _mosaic_params(grid_parallel):
    if grid_parallel:
        return pltpu.CompilerParams(dimension_semantics=("parallel",),
                                    vmem_limit_bytes=_VMEM_LIMIT)
    return pltpu.CompilerParams(vmem_limit_bytes=_VMEM_LIMIT)


@jax.jit
def convembed_forward(x, w1, g1, be1, w2, b2, w3, b3, g2, be2):
    n = x.shape[0]
    cout = w1.shape[0]                                        # 64

    # -------- convhead: Conv2d(3,64,7,s2,p3,no bias) + BN1 + ReLU ----------
    pt1, ho1, wo1 = _patches_cm(x, 7, 2, 3)                   # (K1, M1)
    k1, m1 = pt1.shape
    w1m = w1.reshape(cout, k1).astype(jnp.float32)

    # M tile: 128 at the toy shape; bump toward 512-1024 for real workloads.
    tm = 128 if m1 % 128 == 0 else m1
    nt = m1 // tm

    y1, psum, pssq = pl.pallas_call(
        _conv_mm_stats_kernel,
        grid=(nt,),
        in_specs=[
            pl.BlockSpec((cout, k1), lambda i: (0, 0)),        # weights (whole)
            pl.BlockSpec((k1, tm), lambda i: (0, i)),          # patch M-tile
        ],
        out_specs=[
            pl.BlockSpec((cout, tm), lambda i: (0, i)),        # conv output
            pl.BlockSpec((1, cout, 1), lambda i: (i, 0, 0)),   # partial sum
            pl.BlockSpec((1, cout, 1), lambda i: (i, 0, 0)),   # partial sumsq
        ],
        out_shape=[
            jax.ShapeDtypeStruct((cout, m1), jnp.float32),
            jax.ShapeDtypeStruct((nt, cout, 1), jnp.float32),
            jax.ShapeDtypeStruct((nt, cout, 1), jnp.float32),
        ],
        compiler_params=_mosaic_params(True),
    )(w1m, pt1)

    y1n = pl.pallas_call(
        functools.partial(_bn_act_kernel, inv_count=1.0 / m1, eps=BN_EPS,
                          relu=True),
        grid=(nt,),
        in_specs=[
            pl.BlockSpec((cout, tm), lambda i: (0, i)),
            pl.BlockSpec((nt, cout, 1), lambda i: (0, 0, 0)),
            pl.BlockSpec((nt, cout, 1), lambda i: (0, 0, 0)),
            pl.BlockSpec((cout, 1), lambda i: (0, 0)),
            pl.BlockSpec((cout, 1), lambda i: (0, 0)),
        ],
        out_specs=pl.BlockSpec((cout, tm), lambda i: (0, i)),
        out_shape=jax.ShapeDtypeStruct((cout, m1), jnp.float32),
        compiler_params=_mosaic_params(True),
    )(y1, psum, pssq, g1.reshape(cout, 1), be1.reshape(cout, 1))

    # -------- convhead: MaxPool2d(3, stride=2, padding=1) ------------------
    ho2 = (ho1 + 2 - 3) // 2 + 1
    wo2 = (wo1 + 2 - 3) // 2 + 1
    # (H, W, N*C) layout -> N*C on the lane axis (128 lanes at the toy shape)
    hwnc = (y1n.reshape(cout, n, ho1, wo1)
            .transpose(2, 3, 1, 0)
            .reshape(ho1, wo1, n * cout))
    padded = jnp.pad(hwnc, ((1, 1), (1, 1), (0, 0)),
                     constant_values=-jnp.inf)
    ee = padded[0::2, 0::2]
    eo = padded[0::2, 1::2]
    oe = padded[1::2, 0::2]
    oo = padded[1::2, 1::2]
    assert ee.shape[0] >= ho2 + 1 and ee.shape[1] >= wo2 + 1

    pooled = pl.pallas_call(
        functools.partial(_maxpool3x3s2_kernel, ho=ho2, wo=wo2),
        in_specs=[pl.BlockSpec(memory_space=pltpu.MemorySpace.VMEM)] * 4,
        out_specs=pl.BlockSpec(memory_space=pltpu.MemorySpace.VMEM),
        out_shape=jax.ShapeDtypeStruct((ho2, wo2, n * cout), jnp.float32),
        compiler_params=_mosaic_params(False),
    )(ee, eo, oe, oo)

    pooled_nchw = (pooled.reshape(ho2, wo2, n, cout)
                   .transpose(2, 3, 0, 1))                     # (N, 64, ho2, wo2)

    # -------- net: Conv2d(64,64,3,s2,p1) + Conv2d(64,64,1) + BN2 (fused) ---
    pt2, ho3, wo3 = _patches_cm(pooled_nchw, 3, 2, 1)          # (576, M2)
    k2, m2 = pt2.shape
    w2m = w2.reshape(cout, k2).astype(jnp.float32)
    w3m = w3.reshape(cout, cout).astype(jnp.float32)

    out_flat = pl.pallas_call(
        functools.partial(_net_stage_kernel, eps=BN_EPS),
        in_specs=[pl.BlockSpec(memory_space=pltpu.MemorySpace.VMEM)] * 7,
        out_specs=pl.BlockSpec(memory_space=pltpu.MemorySpace.VMEM),
        out_shape=jax.ShapeDtypeStruct((cout, m2), jnp.float32),
        compiler_params=_mosaic_params(False),
    )(w2m, pt2, b2.reshape(cout, 1), w3m, b3.reshape(cout, 1),
      g2.reshape(cout, 1), be2.reshape(cout, 1))

    return out_flat.reshape(cout, n, ho3, wo3).transpose(1, 0, 2, 3)


# ---------------------------------------------------------------------------
# Pure-JAX reference (same semantics as the PyTorch module with fresh BN)
# ---------------------------------------------------------------------------
def _conv_nchw(x, w, stride, pad):
    return lax.conv_general_dilated(
        x, w, (stride, stride), [(pad, pad), (pad, pad)],
        dimension_numbers=("NCHW", "OIHW", "NCHW"),
        precision=lax.Precision.HIGHEST)


def _bn_train(y, gamma, beta, eps):
    mu = y.mean(axis=(0, 2, 3), keepdims=True)
    var = ((y - mu) ** 2).mean(axis=(0, 2, 3), keepdims=True)
    xhat = (y - mu) / jnp.sqrt(var + eps)
    return xhat * gamma.reshape(1, -1, 1, 1) + beta.reshape(1, -1, 1, 1)


def reference_forward(x, w1, g1, be1, w2, b2, w3, b3, g2, be2):
    y = _conv_nchw(x, w1, 2, 3)
    y = jnp.maximum(_bn_train(y, g1, be1, BN_EPS), 0.0)
    y = lax.reduce_window(y, -jnp.inf, lax.max,
                          (1, 1, 3, 3), (1, 1, 2, 2),
                          [(0, 0), (0, 0), (1, 1), (1, 1)])
    y = _conv_nchw(y, w2, 2, 1) + b2.reshape(1, -1, 1, 1)
    y = _conv_nchw(y, w3, 1, 0) + b3.reshape(1, -1, 1, 1)
    return _bn_train(y, g2, be2, BN_EPS)


if __name__ == "__main__":
    key = jax.random.PRNGKey(0)
    ks = jax.random.split(key, 6)

    N, IMG, C = 2, 32, 64            # small shapes; resnet stem takes RGB input
    x = jax.random.normal(ks[0], (N, 3, IMG, IMG), dtype=jnp.float32)
    w1 = jax.random.normal(ks[1], (C, 3, 7, 7), jnp.float32) * 0.05
    g1 = jnp.ones((C,), jnp.float32)
    be1 = jnp.zeros((C,), jnp.float32)
    w2 = jax.random.normal(ks[2], (C, C, 3, 3), jnp.float32) * 0.05
    b2 = jax.random.normal(ks[3], (C,), jnp.float32) * 0.05
    w3 = jax.random.normal(ks[4], (C, C, 1, 1), jnp.float32) * 0.1
    b3 = jax.random.normal(ks[5], (C,), jnp.float32) * 0.05
    g2 = jnp.ones((C,), jnp.float32)
    be2 = jnp.zeros((C,), jnp.float32)

    out = jax.block_until_ready(
        convembed_forward(x, w1, g1, be1, w2, b2, w3, b3, g2, be2))
    ref = reference_forward(x, w1, g1, be1, w2, b2, w3, b3, g2, be2)

    assert out.shape == ref.shape == (N, C, IMG // 8, IMG // 8), (out.shape,
                                                                  ref.shape)
    if not np.allclose(np.asarray(out), np.asarray(ref), atol=2e-2, rtol=2e-2):
        err = float(np.max(np.abs(np.asarray(out) - np.asarray(ref))))
        raise AssertionError(
            f"Pallas kernel output does not match JAX reference (max err {err})")
    print("KERNEL_OK")
</pallas_src>

<mosaic_0001>
module attributes {stable_mosaic.version = 11 : i64} {
  func.func @_conv_mm_stats_kernel(%arg0: i32, %arg1: memref<64x147xf32, #tpu.memory_space<vmem>>, %arg2: memref<147x128xf32, #tpu.memory_space<vmem>>, %arg3: memref<64x128xf32, #tpu.memory_space<vmem>>, %arg4: memref<1x64x1xf32, #tpu.memory_space<vmem>>, %arg5: memref<1x64x1xf32, #tpu.memory_space<vmem>>) attributes {dimension_semantics = [#tpu.dimension_semantics<parallel>], iteration_bounds = array<i64: 4>, scalar_prefetch = 0 : i64, scratch_operands = 0 : i64, tpu.core_type = #tpu.core_type<tc>, window_params = [{pipeline_mode = #tpu.pipeline_mode<synchronous>, transform_indices = @transform_0, window_bounds = array<i64: 64, 147>}, {transform_indices = @transform_1, window_bounds = array<i64: 147, 128>}, {transform_indices = @transform_2, window_bounds = array<i64: 64, 128>}, {transform_indices = @transform_3, window_bounds = array<i64: 1, 64, 1>}, {transform_indices = @transform_4, window_bounds = array<i64: 1, 64, 1>}]} {
    %c0 = arith.constant 0 : index
    %c0_0 = arith.constant 0 : index
    %0 = vector.load %arg1[%c0, %c0_0] : memref<64x147xf32, #tpu.memory_space<vmem>>, vector<64x147xf32>
    %c0_1 = arith.constant 0 : index
    %c0_2 = arith.constant 0 : index
    %1 = vector.load %arg2[%c0_1, %c0_2] : memref<147x128xf32, #tpu.memory_space<vmem>>, vector<147x128xf32>
    %cst = arith.constant dense<0.000000e+00> : vector<64x128xf32>
    %2 = tpu.matmul %0, %1, %cst {dimension_numbers = #tpu.dot_dimension_numbers<[1], [0], [0], [1], [0, 0, 1, 1], [], []>} : vector<64x147xf32>, vector<147x128xf32>, vector<64x128xf32> -> vector<64x128xf32>
    %c0_3 = arith.constant 0 : index
    %c0_4 = arith.constant 0 : index
    %3 = vector.load %arg3[%c0_3, %c0_4] : memref<64x128xf32, #tpu.memory_space<vmem>>, vector<64x128xf32>
    tpu.vector_store %arg3[%c0_3, %c0_4], %2 {strides = array<i32>} : memref<64x128xf32, #tpu.memory_space<vmem>>, vector<64x128xf32>,
    %cst_5 = arith.constant dense<0.000000e+00> : vector<64xf32>
    %4 = vector.multi_reduction <add>, %2, %cst_5 [1] : vector<64x128xf32> to vector<64xf32>
    %5 = vector.shape_cast %4 : vector<64xf32> to vector<64x1xf32>
    %6 = vector.shape_cast %5 : vector<64x1xf32> to vector<1x64x1xf32>
    %c0_6 = arith.constant 0 : index
    %c0_7 = arith.constant 0 : index
    %c0_8 = arith.constant 0 : index
    %7 = vector.load %arg4[%c0_6, %c0_7, %c0_8] : memref<1x64x1xf32, #tpu.memory_space<vmem>>, vector<1x64x1xf32>
    tpu.vector_store %arg4[%c0_6, %c0_7, %c0_8], %6 {strides = array<i32>} : memref<1x64x1xf32, #tpu.memory_space<vmem>>, vector<1x64x1xf32>,
    %8 = arith.mulf %2, %2 : vector<64x128xf32>
    %cst_9 = arith.constant dense<0.000000e+00> : vector<64xf32>
    %9 = vector.multi_reduction <add>, %8, %cst_9 [1] : vector<64x128xf32> to vector<64xf32>
    %10 = vector.shape_cast %9 : vector<64xf32> to vector<64x1xf32>
    %11 = vector.shape_cast %10 : vector<64x1xf32> to vector<1x64x1xf32>
    %c0_10 = arith.constant 0 : index
    %c0_11 = arith.constant 0 : index
    %c0_12 = arith.constant 0 : index
    %12 = vector.load %arg5[%c0_10, %c0_11, %c0_12] : memref<1x64x1xf32, #tpu.memory_space<vmem>>, vector<1x64x1xf32>
    tpu.vector_store %arg5[%c0_10, %c0_11, %c0_12], %11 {strides = array<i32>} : memref<1x64x1xf32, #tpu.memory_space<vmem>>, vector<1x64x1xf32>,
    return
  }
  func.func @transform_0(%arg0: i32) -> (i32, i32) {
    %c0_i32 = arith.constant 0 : i32
    %c0_i32_0 = arith.constant 0 : i32
    %c0_i32_1 = arith.constant 0 : i32
    return %c0_i32, %c0_i32_0 : i32, i32
  }
  func.func @transform_1(%arg0: i32) -> (i32, i32) {
    %c0_i32 = arith.constant 0 : i32
    %c0_i32_0 = arith.constant 0 : i32
    return %c0_i32, %arg0 : i32, i32
  }
  func.func @transform_2(%arg0: i32) -> (i32, i32) {
    %c0_i32 = arith.constant 0 : i32
    %c0_i32_0 = arith.constant 0 : i32
    return %c0_i32, %arg0 : i32, i32
  }
  func.func @transform_3(%arg0: i32) -> (i32, i32, i32) {
    %c0_i32 = arith.constant 0 : i32
    %c0_i32_0 = arith.constant 0 : i32
    %c0_i32_1 = arith.constant 0 : i32
    return %arg0, %c0_i32, %c0_i32_0 : i32, i32, i32
  }
  func.func @transform_4(%arg0: i32) -> (i32, i32, i32) {
    %c0_i32 = arith.constant 0 : i32
    %c0_i32_0 = arith.constant 0 : i32
    %c0_i32_1 = arith.constant 0 : i32
    return %arg0, %c0_i32, %c0_i32_0 : i32, i32, i32
  }
}

module attributes {stable_mosaic.version = 11 : i64} {
  func.func @_bn_act_kernel(%arg0: i32, %arg1: memref<64x128xf32, #tpu.memory_space<vmem>>, %arg2: memref<4x64x1xf32, #tpu.memory_space<vmem>>, %arg3: memref<4x64x1xf32, #tpu.memory_space<vmem>>, %arg4: memref<64x1xf32, #tpu.memory_space<vmem>>, %arg5: memref<64x1xf32, #tpu.memory_space<vmem>>, %arg6: memref<64x128xf32, #tpu.memory_space<vmem>>) attributes {dimension_semantics = [#tpu.dimension_semantics<parallel>], iteration_bounds = array<i64: 4>, scalar_prefetch = 0 : i64, scratch_operands = 0 : i64, tpu.core_type = #tpu.core_type<tc>, window_params = [{transform_indices = @transform_0, window_bounds = array<i64: 64, 128>}, {pipeline_mode = #tpu.pipeline_mode<synchronous>, transform_indices = @transform_1, window_bounds = array<i64: 4, 64, 1>}, {pipeline_mode = #tpu.pipeline_mode<synchronous>, transform_indices = @transform_2, window_bounds = array<i64: 4, 64, 1>}, {pipeline_mode = #tpu.pipeline_mode<synchronous>, transform_indices = @transform_3, window_bounds = array<i64: 64, 1>}, {pipeline_mode = #tpu.pipeline_mode<synchronous>, transform_indices = @transform_4, window_bounds = array<i64: 64, 1>}, {transform_indices = @transform_5, window_bounds = array<i64: 64, 128>}]} {
    %c0 = arith.constant 0 : index
    %c0_0 = arith.constant 0 : index
    %c0_1 = arith.constant 0 : index
    %0 = vector.load %arg2[%c0, %c0_0, %c0_1] : memref<4x64x1xf32, #tpu.memory_space<vmem>>, vector<4x64x1xf32>
    %cst = arith.constant dense<0.000000e+00> : vector<64x1xf32>
    %1 = vector.multi_reduction <add>, %0, %cst [0] : vector<4x64x1xf32> to vector<64x1xf32>
    %c0_2 = arith.constant 0 : index
    %c0_3 = arith.constant 0 : index
    %c0_4 = arith.constant 0 : index
    %2 = vector.load %arg3[%c0_2, %c0_3, %c0_4] : memref<4x64x1xf32, #tpu.memory_space<vmem>>, vector<4x64x1xf32>
    %cst_5 = arith.constant dense<0.000000e+00> : vector<64x1xf32>
    %3 = vector.multi_reduction <add>, %2, %cst_5 [0] : vector<4x64x1xf32> to vector<64x1xf32>
    %cst_6 = arith.constant 0.001953125 : f32
    %4 = vector.broadcast %cst_6 : f32 to vector<64x1xf32>
    %5 = arith.mulf %1, %4 : vector<64x1xf32>
    %cst_7 = arith.constant 0.001953125 : f32
    %6 = vector.broadcast %cst_7 : f32 to vector<64x1xf32>
    %7 = arith.mulf %3, %6 : vector<64x1xf32>
    %8 = arith.mulf %5, %5 : vector<64x1xf32>
    %9 = arith.subf %7, %8 : vector<64x1xf32>
    %cst_8 = arith.constant 9.99999974E-6 : f32
    %10 = vector.broadcast %cst_8 : f32 to vector<64x1xf32>
    %11 = arith.addf %9, %10 : vector<64x1xf32>
    %12 = math.rsqrt %11 : vector<64x1xf32>
    %c0_9 = arith.constant 0 : index
    %c0_10 = arith.constant 0 : index
    %13 = vector.load %arg4[%c0_9, %c0_10] : memref<64x1xf32, #tpu.memory_space<vmem>>, vector<64x1xf32>
    %14 = arith.mulf %13, %12 : vector<64x1xf32>
    %c0_11 = arith.constant 0 : index
    %c0_12 = arith.constant 0 : index
    %15 = vector.load %arg5[%c0_11, %c0_12] : memref<64x1xf32, #tpu.memory_space<vmem>>, vector<64x1xf32>
    %16 = arith.mulf %5, %14 : vector<64x1xf32>
    %17 = arith.subf %15, %16 : vector<64x1xf32>
    %c0_13 = arith.constant 0 : index
    %c0_14 = arith.constant 0 : index
    %18 = vector.load %arg1[%c0_13, %c0_14] : memref<64x128xf32, #tpu.memory_space<vmem>>, vector<64x128xf32>
    %19 = vector.broadcast %14 : vector<64x1xf32> to vector<64x128xf32>
    %20 = arith.mulf %18, %19 : vector<64x128xf32>
    %21 = vector.broadcast %17 : vector<64x1xf32> to vector<64x128xf32>
    %22 = arith.addf %20, %21 : vector<64x128xf32>
    %cst_15 = arith.constant 0.000000e+00 : f32
    %23 = vector.broadcast %cst_15 : f32 to vector<64x128xf32>
    %24 = arith.maximumf %22, %23 : vector<64x128xf32>
    %c0_16 = arith.constant 0 : index
    %c0_17 = arith.constant 0 : index
    %25 = vector.load %arg6[%c0_16, %c0_17] : memref<64x128xf32, #tpu.memory_space<vmem>>, vector<64x128xf32>
    tpu.vector_store %arg6[%c0_16, %c0_17], %24 {strides = array<i32>} : memref<64x128xf32, #tpu.memory_space<vmem>>, vector<64x128xf32>,
    return
  }
  func.func @transform_0(%arg0: i32) -> (i32, i32) {
    %c0_i32 = arith.constant 0 : i32
    %c0_i32_0 = arith.constant 0 : i32
    return %c0_i32, %arg0 : i32, i32
  }
  func.func @transform_1(%arg0: i32) -> (i32, i32, i32) {
    %c0_i32 = arith.constant 0 : i32
    %c0_i32_0 = arith.constant 0 : i32
    %c0_i32_1 = arith.constant 0 : i32
    %c0_i32_2 = arith.constant 0 : i32
    return %c0_i32, %c0_i32_0, %c0_i32_1 : i32, i32, i32
  }
  func.func @transform_2(%arg0: i32) -> (i32, i32, i32) {
    %c0_i32 = arith.constant 0 : i32
    %c0_i32_0 = arith.constant 0 : i32
    %c0_i32_1 = arith.constant 0 : i32
    %c0_i32_2 = arith.constant 0 : i32
    return %c0_i32, %c0_i32_0, %c0_i32_1 : i32, i32, i32
  }
  func.func @transform_3(%arg0: i32) -> (i32, i32) {
    %c0_i32 = arith.constant 0 : i32
    %c0_i32_0 = arith.constant 0 : i32
    %c0_i32_1 = arith.constant 0 : i32
    return %c0_i32, %c0_i32_0 : i32, i32
  }
  func.func @transform_4(%arg0: i32) -> (i32, i32) {
    %c0_i32 = arith.constant 0 : i32
    %c0_i32_0 = arith.constant 0 : i32
    %c0_i32_1 = arith.constant 0 : i32
    return %c0_i32, %c0_i32_0 : i32, i32
  }
  func.func @transform_5(%arg0: i32) -> (i32, i32) {
    %c0_i32 = arith.constant 0 : i32
    %c0_i32_0 = arith.constant 0 : i32
    return %c0_i32, %arg0 : i32, i32
  }
}

module attributes {stable_mosaic.version = 11 : i64} {
  func.func @_maxpool3x3s2_kernel(%arg0: memref<9x9x128xf32, #tpu.memory_space<vmem>>, %arg1: memref<9x9x128xf32, #tpu.memory_space<vmem>>, %arg2: memref<9x9x128xf32, #tpu.memory_space<vmem>>, %arg3: memref<9x9x128xf32, #tpu.memory_space<vmem>>, %arg4: memref<8x8x128xf32, #tpu.memory_space<vmem>>) attributes {dimension_semantics = [], scalar_prefetch = 0 : i64, scratch_operands = 0 : i64, tpu.core_type = #tpu.core_type<tc>} {
    %c0 = arith.constant 0 : index
    %c0_0 = arith.constant 0 : index
    %c0_1 = arith.constant 0 : index
    %0 = vector.load %arg0[%c0, %c0_0, %c0_1] : memref<9x9x128xf32, #tpu.memory_space<vmem>>, vector<9x9x128xf32>
    %c0_2 = arith.constant 0 : index
    %c0_3 = arith.constant 0 : index
    %c0_4 = arith.constant 0 : index
    %1 = vector.load %arg1[%c0_2, %c0_3, %c0_4] : memref<9x9x128xf32, #tpu.memory_space<vmem>>, vector<9x9x128xf32>
    %c0_5 = arith.constant 0 : index
    %c0_6 = arith.constant 0 : index
    %c0_7 = arith.constant 0 : index
    %2 = vector.load %arg2[%c0_5, %c0_6, %c0_7] : memref<9x9x128xf32, #tpu.memory_space<vmem>>, vector<9x9x128xf32>
    %c0_8 = arith.constant 0 : index
    %c0_9 = arith.constant 0 : index
    %c0_10 = arith.constant 0 : index
    %3 = vector.load %arg3[%c0_8, %c0_9, %c0_10] : memref<9x9x128xf32, #tpu.memory_space<vmem>>, vector<9x9x128xf32>
    %4 = vector.extract_strided_slice %0 {offsets = [0, 0, 0], sizes = [8, 8, 128], strides = [1, 1, 1]} : vector<9x9x128xf32> to vector<8x8x128xf32>
    %5 = vector.extract_strided_slice %1 {offsets = [0, 0, 0], sizes = [8, 8, 128], strides = [1, 1, 1]} : vector<9x9x128xf32> to vector<8x8x128xf32>
    %6 = arith.maximumf %4, %5 : vector<8x8x128xf32>
    %7 = vector.extract_strided_slice %0 {offsets = [0, 1, 0], sizes = [8, 8, 128], strides = [1, 1, 1]} : vector<9x9x128xf32> to vector<8x8x128xf32>
    %8 = arith.maximumf %6, %7 : vector<8x8x128xf32>
    %9 = vector.extract_strided_slice %2 {offsets = [0, 0, 0], sizes = [8, 8, 128], strides = [1, 1, 1]} : vector<9x9x128xf32> to vector<8x8x128xf32>
    %10 = arith.maximumf %8, %9 : vector<8x8x128xf32>
    %11 = vector.extract_strided_slice %3 {offsets = [0, 0, 0], sizes = [8, 8, 128], strides = [1, 1, 1]} : vector<9x9x128xf32> to vector<8x8x128xf32>
    %12 = arith.maximumf %10, %11 : vector<8x8x128xf32>
    %13 = vector.extract_strided_slice %2 {offsets = [0, 1, 0], sizes = [8, 8, 128], strides = [1, 1, 1]} : vector<9x9x128xf32> to vector<8x8x128xf32>
    %14 = arith.maximumf %12, %13 : vector<8x8x128xf32>
    %15 = vector.extract_strided_slice %0 {offsets = [1, 0, 0], sizes = [8, 8, 128], strides = [1, 1, 1]} : vector<9x9x128xf32> to vector<8x8x128xf32>
    %16 = arith.maximumf %14, %15 : vector<8x8x128xf32>
    %17 = vector.extract_strided_slice %1 {offsets = [1, 0, 0], sizes = [8, 8, 128], strides = [1, 1, 1]} : vector<9x9x128xf32> to vector<8x8x128xf32>
    %18 = arith.maximumf %16, %17 : vector<8x8x128xf32>
    %19 = vector.extract_strided_slice %0 {offsets = [1, 1, 0], sizes = [8, 8, 128], strides = [1, 1, 1]} : vector<9x9x128xf32> to vector<8x8x128xf32>
    %20 = arith.maximumf %18, %19 : vector<8x8x128xf32>
    %c0_11 = arith.constant 0 : index
    %c0_12 = arith.constant 0 : index
    %c0_13 = arith.constant 0 : index
    %21 = vector.load %arg4[%c0_11, %c0_12, %c0_13] : memref<8x8x128xf32, #tpu.memory_space<vmem>>, vector<8x8x128xf32>
    tpu.vector_store %arg4[%c0_11, %c0_12, %c0_13], %20 {strides = array<i32>} : memref<8x8x128xf32, #tpu.memory_space<vmem>>, vector<8x8x128xf32>,
    return
  }
}

module attributes {stable_mosaic.version = 11 : i64} {
  func.func @_net_stage_kernel(%arg0: memref<64x576xf32, #tpu.memory_space<vmem>>, %arg1: memref<576x32xf32, #tpu.memory_space<vmem>>, %arg2: memref<64x1xf32, #tpu.memory_space<vmem>>, %arg3: memref<64x64xf32, #tpu.memory_space<vmem>>, %arg4: memref<64x1xf32, #tpu.memory_space<vmem>>, %arg5: memref<64x1xf32, #tpu.memory_space<vmem>>, %arg6: memref<64x1xf32, #tpu.memory_space<vmem>>, %arg7: memref<64x32xf32, #tpu.memory_space<vmem>>) attributes {dimension_semantics = [], scalar_prefetch = 0 : i64, scratch_operands = 0 : i64, tpu.core_type = #tpu.core_type<tc>} {
    %c0 = arith.constant 0 : index
    %c0_0 = arith.constant 0 : index
    %0 = vector.load %arg0[%c0, %c0_0] : memref<64x576xf32, #tpu.memory_space<vmem>>, vector<64x576xf32>
    %c0_1 = arith.constant 0 : index
    %c0_2 = arith.constant 0 : index
    %1 = vector.load %arg1[%c0_1, %c0_2] : memref<576x32xf32, #tpu.memory_space<vmem>>, vector<576x32xf32>
    %cst = arith.constant dense<0.000000e+00> : vector<64x32xf32>
    %2 = tpu.matmul %0, %1, %cst {dimension_numbers = #tpu.dot_dimension_numbers<[1], [0], [0], [1], [0, 0, 1, 1], [], []>} : vector<64x576xf32>, vector<576x32xf32>, vector<64x32xf32> -> vector<64x32xf32>
    %c0_3 = arith.constant 0 : index
    %c0_4 = arith.constant 0 : index
    %3 = vector.load %arg2[%c0_3, %c0_4] : memref<64x1xf32, #tpu.memory_space<vmem>>, vector<64x1xf32>
    %4 = vector.broadcast %3 : vector<64x1xf32> to vector<64x32xf32>
    %5 = arith.addf %2, %4 : vector<64x32xf32>
    %c0_5 = arith.constant 0 : index
    %c0_6 = arith.constant 0 : index
    %6 = vector.load %arg3[%c0_5, %c0_6] : memref<64x64xf32, #tpu.memory_space<vmem>>, vector<64x64xf32>
    %cst_7 = arith.constant dense<0.000000e+00> : vector<64x32xf32>
    %7 = tpu.matmul %6, %5, %cst_7 {dimension_numbers = #tpu.dot_dimension_numbers<[1], [0], [0], [1], [0, 0, 1, 1], [], []>} : vector<64x64xf32>, vector<64x32xf32>, vector<64x32xf32> -> vector<64x32xf32>
    %c0_8 = arith.constant 0 : index
    %c0_9 = arith.constant 0 : index
    %8 = vector.load %arg4[%c0_8, %c0_9] : memref<64x1xf32, #tpu.memory_space<vmem>>, vector<64x1xf32>
    %9 = vector.broadcast %8 : vector<64x1xf32> to vector<64x32xf32>
    %10 = arith.addf %7, %9 : vector<64x32xf32>
    %cst_10 = arith.constant dense<0.000000e+00> : vector<64xf32>
    %11 = vector.multi_reduction <add>, %10, %cst_10 [1] : vector<64x32xf32> to vector<64xf32>
    %12 = vector.shape_cast %11 : vector<64xf32> to vector<64x1xf32>
    %cst_11 = arith.constant 3.200000e+01 : f32
    %13 = vector.broadcast %cst_11 : f32 to vector<64x1xf32>
    %14 = arith.divf %12, %13 : vector<64x1xf32>
    %15 = vector.broadcast %14 : vector<64x1xf32> to vector<64x32xf32>
    %16 = arith.subf %10, %15 : vector<64x32xf32>
    %17 = vector.broadcast %14 : vector<64x1xf32> to vector<64x32xf32>
    %18 = arith.subf %10, %17 : vector<64x32xf32>
    %19 = arith.mulf %16, %18 : vector<64x32xf32>
    %cst_12 = arith.constant dense<0.000000e+00> : vector<64xf32>
    %20 = vector.multi_reduction <add>, %19, %cst_12 [1] : vector<64x32xf32> to vector<64xf32>
    %21 = vector.shape_cast %20 : vector<64xf32> to vector<64x1xf32>
    %cst_13 = arith.constant 3.200000e+01 : f32
    %22 = vector.broadcast %cst_13 : f32 to vector<64x1xf32>
    %23 = arith.divf %21, %22 : vector<64x1xf32>
    %cst_14 = arith.constant 9.99999974E-6 : f32
    %24 = vector.broadcast %cst_14 : f32 to vector<64x1xf32>
    %25 = arith.addf %23, %24 : vector<64x1xf32>
    %26 = math.rsqrt %25 : vector<64x1xf32>
    %c0_15 = arith.constant 0 : index
    %c0_16 = arith.constant 0 : index
    %27 = vector.load %arg5[%c0_15, %c0_16] : memref<64x1xf32, #tpu.memory_space<vmem>>, vector<64x1xf32>
    %28 = arith.mulf %27, %26 : vector<64x1xf32>
    %c0_17 = arith.constant 0 : index
    %c0_18 = arith.constant 0 : index
    %29 = vector.load %arg6[%c0_17, %c0_18] : memref<64x1xf32, #tpu.memory_space<vmem>>, vector<64x1xf32>
    %30 = arith.mulf %14, %28 : vector<64x1xf32>
    %31 = arith.subf %29, %30 : vector<64x1xf32>
    %32 = vector.broadcast %28 : vector<64x1xf32> to vector<64x32xf32>
    %33 = arith.mulf %10, %32 : vector<64x32xf32>
    %34 = vector.broadcast %31 : vector<64x1xf32> to vector<64x32xf32>
    %35 = arith.addf %33, %34 : vector<64x32xf32>
    %c0_19 = arith.constant 0 : index
    %c0_20 = arith.constant 0 : index
    %36 = vector.load %arg7[%c0_19, %c0_20] : memref<64x32xf32, #tpu.memory_space<vmem>>, vector<64x32xf32>
    tpu.vector_store %arg7[%c0_19, %c0_20], %35 {strides = array<i32>} : memref<64x32xf32, #tpu.memory_space<vmem>>, vector<64x32xf32>,
    return
  }
}

</mosaic_0001>

<bundles_post_ra>
// kernel: convembed_forward.4
= control target key start
LH: loop header
LB: loop body
LE: loop exit
PB: predicated region body
PF: predicated region fallthrough
CT: control target
= control target key end

     0   :  { %s891_s15 = smov 0   ;;  %s893_s16 = smov 0   ;;  %s1154_s0 = inlined_call_operand.vmem [shape: f32[64,147], index: 0, kind: input, shape index: {}]   ;;  %s1155_s1 = inlined_call_operand.vmem [shape: f32[147,512], index: 1, kind: input, shape index: {}]   ;;  %s1156_s2 = inlined_call_operand.vmem [shape: f32[64,512], index: 2, kind: output, shape index: {0}]   ;;  %s1157_s3 = inlined_call_operand.vmem [shape: f32[4,64,1], index: 3, kind: output, shape index: {1}]   ;;  %s1158_s4 = inlined_call_operand.vmem [shape: f32[4,64,1], index: 4, kind: output, shape index: {2}]  }
   0x1   :  { %s895_s17 = smov 0  }
   0x2 LB: > { %s907_s18 = sadd.s32 4294967295, %s863_s17   ;;  %s910_s19 = sadd.s32 1, %s863_s17   ;;  %s863_s17 = sphi %s895_s17, %s1162_s17   ;;  %s859_s16 = sphi %s893_s16, %s1161_s16   ;;  %s855_s15 = sphi %s891_s15, %s1160_s15  }
   0x3   : > { %s40_s20 = ssub.s32 %s863_s17, %s910_s19  ;;  %s43_s21 = sadd.s32 1, %s859_s16 }
   0x4   : > { %p41_p0 = scmp.eq.s32.totalorder %s40_s20, 0  ;;  %p50_p1 = scmp.ne.s32.totalorder %s859_s16, %s855_s15 }
   0x5   : > { %p51_p2 = scmp.eq.s32.totalorder %s863_s17, 0  ;;  %p80_p3 = scmp.eq.s32.totalorder %s907_s18, 3 }
   0x6   : > { %s920_s22 = scalar_select %p41_p0, %s859_s16, %s43_s21  }
   0x7   : > { %p52_p4 = por %p51_p2, %p50_p1  ;;  %p922_p5 = por %p80_p3, %p50_p1 }
   0x8   : > { %p753_p6 = scmp.ge.s32.totalorder %s863_s17, 4 }
   0xa   : > { %157 = sbr.rel (%p753_p6) target bundleno = 38 (0x26), region = 20 }
   0xf   : > { %160 = sbr.rel (!%p52_p4) target bundleno = 38 (0x26), region = 24  ;;  %s162_s24 = sand.u32 (%p52_p4), 1, %s859_s16  }
  0x10   : > { %s754_s25 = sshll.u32 (%p52_p4), %s863_s17, 3  ;;  %s814_s26 = smul.u32 (%p52_p4), 152, %s162_s24 }
  0x11   : > { %s932_s29 = scalar_lea.vmem (%p52_p4), %s1155_s1, %s754_s25 }
  0x12   : > { %v231_v0 = vld [vmem:[%s932_s29] sm:$0xff] (%p52_p4)  ;;  %s940_s30 = scalar_lea.vmem (%p52_p4), [#allocation2], %s814_s26 }
  0x13   : > { %v233_v1 = vld [vmem:[%s932_s29 + $0x20] sm:$0xff] (%p52_p4)  ;;  %232 = vst [vmem:[%s940_s30] sm:$0xff] (%p52_p4), %v231_v0 }
  0x14   : > { %v235_v2 = vld [vmem:[%s932_s29 + $0x40] sm:$0xff]  ;;  %234 = vst [vmem:[%s940_s30 + $0x8] sm:$0xff] %v233_v1 }
  0x15   : > { %v237_v3 = vld [vmem:[%s932_s29 + $0x60] sm:$0xff]  ;;  %236 = vst [vmem:[%s940_s30 + $0x10] sm:$0xff] %v235_v2 }
  0x16   : > { %v239_v4 = vld [vmem:[%s932_s29 + $0x80] sm:$0xff]  ;;  %238 = vst [vmem:[%s940_s30 + $0x18] sm:$0xff] %v237_v3 }
  0x17   : > { %v241_v5 = vld [vmem:[%s932_s29 + $0xa0] sm:$0xff]  ;;  %240 = vst [vmem:[%s940_s30 + $0x20] sm:$0xff] %v239_v4 }
  0x18   : > { %242 = vst [vmem:[%s940_s30 + $0x28] sm:$0xff] %v241_v5  ;;  %v243_v6 = vld [vmem:[%s932_s29 + $0xc0] sm:$0xff] }
  0x19   : > { %v245_v7 = vld [vmem:[%s932_s29 + $0xe0] sm:$0xff]  ;;  %244 = vst [vmem:[%s940_s30 + $0x30] sm:$0xff] %v243_v6 }
  0x1a   : > { %v247_v8 = vld [vmem:[%s932_s29 + $0x100] sm:$0xff]  ;;  %246 = vst [vmem:[%s940_s30 + $0x38] sm:$0xff] %v245_v7 }
  0x1b   : > { %248 = vst [vmem:[%s940_s30 + $0x40] sm:$0xff] %v247_v8  ;;  %v249_v9 = vld [vmem:[%s932_s29 + $0x120] sm:$0xff] }
  0x1c   : > { %v251_v10 = vld [vmem:[%s932_s29 + $0x140] sm:$0xff]  ;;  %250 = vst [vmem:[%s940_s30 + $0x48] sm:$0xff] %v249_v9 }
  0x1d   : > { %v253_v11 = vld [vmem:[%s932_s29 + $0x160] sm:$0xff]  ;;  %252 = vst [vmem:[%s940_s30 + $0x50] sm:$0xff] %v251_v10 }
  0x1e   : > { %254 = vst [vmem:[%s940_s30 + $0x58] sm:$0xff] %v253_v11  ;;  %v255_v12 = vld [vmem:[%s932_s29 + $0x180] sm:$0xff] }
  0x1f   : > { %v257_v13 = vld [vmem:[%s932_s29 + $0x1a0] sm:$0xff]  ;;  %256 = vst [vmem:[%s940_s30 + $0x60] sm:$0xff] %v255_v12 }
  0x20   : > { %v259_v14 = vld [vmem:[%s932_s29 + $0x1c0] sm:$0xff]  ;;  %258 = vst [vmem:[%s940_s30 + $0x68] sm:$0xff] %v257_v13 }
  0x21   : > { %260 = vst [vmem:[%s940_s30 + $0x70] sm:$0xff] %v259_v14  ;;  %v261_v15 = vld [vmem:[%s932_s29 + $0x1e0] sm:$0xff] }
  0x22   : > { %v263_v16 = vld [vmem:[%s932_s29 + $0x200] sm:$0xff]  ;;  %262 = vst [vmem:[%s940_s30 + $0x78] sm:$0xff] %v261_v15 }
  0x23   : > { %v265_v17 = vld [vmem:[%s932_s29 + $0x220] sm:$0xff]  ;;  %264 = vst [vmem:[%s940_s30 + $0x80] sm:$0xff] %v263_v16 }
  0x24   : > { %266 = vst [vmem:[%s940_s30 + $0x88] sm:$0xff] %v265_v17  ;;  %v267_v18 = vld [vmem:[%s932_s29 + $0x240] sm:$0xff] }
  0x25   : > { %268 = vst [vmem:[%s940_s30 + $0x90] sm:$0xff] %v267_v18 }
  0x26 PF: > { %p755_p7 = scmp.ge.s32.totalorder %s863_s17, 1  ;;  %p273_p8 = scmp.lt.s32.totalorder %s863_s17, 5 }
  0x28   : > { %p274_p9 = pnand %p755_p7, %p273_p8 }
  0x29   : > { %s280_s5 = sand.u32 (!%p274_p9), 1, %s855_s15   ;;  %p314_p10 = scmp.lt.s32.totalorder (!%p274_p9), %s907_s18, 3 }
  0x2a   : > { %277 = sbr.rel (%p274_p9) target bundleno = 451 (0x1c3), region = 62  ;;  %s756_s27 = sshll.u32 (!%p274_p9), %s280_s5, 6 }
  0x2b   : > { %s815_s10 = smul.u32 (!%p274_p9), 152, %s280_s5  ;;  %s1096_s28 = scalar_lea.vmem (!%p274_p9), [#allocation3], %s756_s27 }
  0x2d   : > { %s989_s11 = scalar_lea.vmem (!%p274_p9), [#allocation2], %s815_s10 }
  0x2f   : > { %v325_v19 = vld [vmem:[%s1154_s0 + $0x8] sm:$0xff]  ;;  %vm359_vm0 = vcmask 154624   ;;  %v865_v21 = vmov 0.0   ;;  %v355_v22 = vld [vmem:[%s989_s11 + $0x78] sm:$0xff]  ;;  %v352_v25 = vld [vmem:[%s989_s11 + $0x60] sm:$0xff]  ;;  %vm384_vm1 = vcmask 1042432  }
  0x30   : > { %v333_v20 = vld [vmem:[%s1154_s0 + $0x48] sm:$0xff]  ;;  %388 = vmatprep.subr.mxu0 %v865_v21  ;;  %776 = vmatprep.subr.mxu1 %v865_v21  ;;  %v351_v26 = vld [vmem:[%s989_s11 + $0x58] sm:$0xff]  ;;  %v348_v29 = vld [vmem:[%s989_s11 + $0x40] sm:$0xff]  ;;  %s315_s15 = scalar_select %p314_p10, %s907_s18, 3  ;;  %vm517_vm2 = vcmask 7168  }
  0x31   : > { %762 = vmatprep.mubr.msk.f32.mxu0 %vm359_vm0, %v325_v19  ;;  %766 = vmatprep.mubr.msk.f32.mxu1 %vm359_vm0, %v333_v20  ;;  %v354_v23 = vld [vmem:[%s989_s11 + $0x70] sm:$0xff]  ;;  %v353_v24 = vld [vmem:[%s989_s11 + $0x68] sm:$0xff]  ;;  %v347_v30 = vld [vmem:[%s989_s11 + $0x38] sm:$0xff]  ;;  %s771_s10 = sshll.u32 (%p922_p5), %s907_s18, 3 }
  0x32   : > { %389 = vmatpush1.msra.mxu0 %v355_v22  ;;  %795 = vmatpush1.msra.mxu1 %v355_v22  ;;  %v350_v27 = vld [vmem:[%s989_s11 + $0x50] sm:$0xff]  ;;  %v349_v28 = vld [vmem:[%s989_s11 + $0x48] sm:$0xff]  ;;  %v344_v33 = vld [vmem:[%s989_s11 + $0x20] sm:$0xff]  ;;  %s774_s5 = sshll.u32 %s315_s15, 6  ;;  %s576_s13 = scalar_lea.vmem (%p922_p5), %s1156_s2, %s771_s10 }
  0x33   : > { %390 = vmatprep.subr.mxu0 %v865_v21  ;;  %777 = vmatprep.subr.mxu1 %v865_v21  ;;  %v346_v31 = vld [vmem:[%s989_s11 + $0x30] sm:$0xff]  ;;  %v345_v32 = vld [vmem:[%s989_s11 + $0x28] sm:$0xff]  ;;  %v343_v34 = vld [vmem:[%s989_s11 + $0x18] sm:$0xff]  ;;  %s318_s6 = scalar_lea.vmem %s1157_s3, %s774_s5  ;;  %s323_s9 = scalar_lea.vmem %s1158_s4, %s774_s5 }
  0x34   : > { %391 = vmatpush1.msra.mxu0 %v354_v23  ;;  %796 = vmatpush1.msra.mxu1 %v354_v23  ;;  %v342_v35 = vld [vmem:[%s989_s11 + $0x10] sm:$0xff]  ;;  %v341_v36 = vld [vmem:[%s989_s11 + $0x8] sm:$0xff]  ;;  %v340_v37 = vld [vmem:[%s989_s11] sm:$0xff] }
  0x35   : > { %392 = vmatprep.subr.mxu0 %v865_v21  ;;  %778 = vmatprep.subr.mxu1 %v865_v21  ;;  %v358_v38 = vld [vmem:[%s989_s11 + $0x90] sm:$0x7]  ;;  %v357_v39 = vld [vmem:[%s989_s11 + $0x88] sm:$0xff]  ;;  %v356_v40 = vld [vmem:[%s989_s11 + $0x80] sm:$0xff] }
  0x36   : > { %393 = vmatpush1.msra.mxu0 %v353_v24  ;;  %797 = vmatpush1.msra.mxu1 %v353_v24  ;;  %v324_v41 = vld [vmem:[%s1154_s0] sm:$0xff]  ;;  %v327_v43 = vld [vmem:[%s1154_s0 + $0x18] sm:$0xff]  ;;  %v326_v45 = vld [vmem:[%s1154_s0 + $0x10] sm:$0xff] }
  0x37   : > { %394 = vmatprep.subr.mxu0 %v865_v21  ;;  %779 = vmatprep.subr.mxu1 %v865_v21  ;;  %v332_v42 = vld [vmem:[%s1154_s0 + $0x40] sm:$0xff]  ;;  %v335_v44 = vld [vmem:[%s1154_s0 + $0x58] sm:$0xff]  ;;  %v334_v46 = vld [vmem:[%s1154_s0 + $0x50] sm:$0xff] }
  0x38   : > { %395 = vmatpush1.msra.mxu0 %v352_v25  ;;  %798 = vmatpush1.msra.mxu1 %v352_v25  ;;  %v329_v47 = vld [vmem:[%s1154_s0 + $0x28] sm:$0xff]  ;;  %v328_v49 = vld [vmem:[%s1154_s0 + $0x20] sm:$0xff]  ;;  %v331_v51 = vld [vmem:[%s1154_s0 + $0x38] sm:$0xff] }
  0x39   : > { %396 = vmatprep.subr.mxu0 %v865_v21  ;;  %780 = vmatprep.subr.mxu1 %v865_v21  ;;  %v337_v48 = vld [vmem:[%s1154_s0 + $0x68] sm:$0xff]  ;;  %v336_v50 = vld [vmem:[%s1154_s0 + $0x60] sm:$0xff]  ;;  %v339_v52 = vld [vmem:[%s1154_s0 + $0x78] sm:$0xff] }
  0x3a   : > { %397 = vmatpush1.msra.mxu0 %v351_v26  ;;  %799 = vmatpush1.msra.mxu1 %v351_v26  ;;  %v330_v53 = vld [vmem:[%s1154_s0 + $0x30] sm:$0xff] }
  0x3b   : > { %398 = vmatprep.subr.mxu0 %v865_v21  ;;  %781 = vmatprep.subr.mxu1 %v865_v21  ;;  %v338_v54 = vld [vmem:[%s1154_s0 + $0x70] sm:$0xff] }
  0x3c   : > { %399 = vmatpush1.msra.mxu0 %v350_v27  ;;  %800 = vmatpush1.msra.mxu1 %v350_v27 }
  0x3d   : > { %400 = vmatprep.subr.mxu0 %v865_v21  ;;  %782 = vmatprep.subr.mxu1 %v865_v21 }
  0x3e   : > { %401 = vmatpush1.msra.mxu0 %v349_v28  ;;  %801 = vmatpush1.msra.mxu1 %v349_v28 }
  0x3f   : > { %402 = vmatprep.subr.mxu0 %v865_v21  ;;  %783 = vmatprep.subr.mxu1 %v865_v21 }
  0x40   : > { %403 = vmatpush1.msra.mxu0 %v348_v29  ;;  %802 = vmatpush1.msra.mxu1 %v348_v29 }
  0x41   : > { %404 = vmatprep.subr.mxu0 %v865_v21  ;;  %784 = vmatprep.subr.mxu1 %v865_v21 }
  0x42   : > { %405 = vmatpush1.msra.mxu0 %v347_v30  ;;  %803 = vmatpush1.msra.mxu1 %v347_v30 }
  0x43   : > { %406 = vmatprep.subr.mxu0 %v865_v21  ;;  %785 = vmatprep.subr.mxu1 %v865_v21 }
  0x44   : > { %407 = vmatpush1.msra.mxu0 %v346_v31  ;;  %804 = vmatpush1.msra.mxu1 %v346_v31 }
  0x45   : > { %408 = vmatprep.subr.mxu0 %v865_v21  ;;  %786 = vmatprep.subr.mxu1 %v865_v21 }
  0x46   : > { %409 = vmatpush1.msra.mxu0 %v345_v32  ;;  %805 = vmatpush1.msra.mxu1 %v345_v32 }
  0x47   : > { %410 = vmatprep.subr.mxu0 %v865_v21  ;;  %787 = vmatprep.subr.mxu1 %v865_v21 }
  0x48   : > { %411 = vmatpush1.msra.mxu0 %v344_v33  ;;  %806 = vmatpush1.msra.mxu1 %v344_v33 }
  0x49   : > { %412 = vmatprep.subr.mxu0 %v865_v21  ;;  %788 = vmatprep.subr.mxu1 %v865_v21 }
  0x4a   : > { %413 = vmatpush1.msra.mxu0 %v343_v34  ;;  %807 = vmatpush1.msra.mxu1 %v343_v34 }
  0x4b   : > { %414 = vmatprep.subr.mxu0 %v865_v21  ;;  %789 = vmatprep.subr.mxu1 %v865_v21 }
  0x4c   : > { %415 = vmatpush1.msra.mxu0 %v342_v35  ;;  %808 = vmatpush1.msra.mxu1 %v342_v35 }
  0x4d   : > { %416 = vmatprep.subr.mxu0 %v865_v21  ;;  %790 = vmatprep.subr.mxu1 %v865_v21 }
  0x4e   : > { %417 = vmatpush1.msra.mxu0 %v341_v36  ;;  %809 = vmatpush1.msra.mxu1 %v341_v36 }
  0x4f   : > { %418 = vmatprep.subr.mxu0 %v865_v21  ;;  %791 = vmatprep.subr.mxu1 %v865_v21 }
  0x50   : > { %419 = vmatpush1.msra.mxu0 %v340_v37  ;;  %810 = vmatpush1.msra.mxu1 %v340_v37 }
  0x51   : > { %446 = vmatprep.subr.mxu0 %v865_v21  ;;  %792 = vmatprep.subr.mxu1 %v865_v21 }
  0x52   : > { %761 = vmatpush2.msk.msra.mxu0 %vm384_vm1, %v358_v38  ;;  %811 = vmatpush2.msk.msra.mxu1 %vm384_vm1, %v358_v38 }
  0x53   : > { %448 = vmatprep.subr.mxu0 %v865_v21  ;;  %793 = vmatprep.subr.mxu1 %v865_v21 }
  0x54   : > { %449 = vmatpush2.msra.mxu0 %v357_v39  ;;  %812 = vmatpush2.msra.mxu1 %v357_v39 }
  0x55   : > { %450 = vmatprep.subr.mxu0 %v865_v21  ;;  %794 = vmatprep.subr.mxu1 %v865_v21 }
  0x56   : > { %451 = vmatpush2.msra.mxu0 %v356_v40  ;;  %813 = vmatpush2.msra.mxu1 %v356_v40 }
  0x57   : > { %453 = vmatmul.mubr.f32.vlgmr.msra.gmra.mxu0 %v324_v41  ;;  %473 = vmatmul.mubr.f32.vlgmr.msra.gmra.mxu1 %v332_v42 }
  0x58   : > { %763 = vmatprep.mubr.msk.f32.mxu0 %vm359_vm0, %v327_v43  ;;  %767 = vmatprep.mubr.msk.f32.mxu1 %vm359_vm0, %v335_v44 }
  0x5b   : > { %458 = vmatmul.mubr.f32.gmra.mxu0 %v326_v45  ;;  %478 = vmatmul.mubr.f32.gmra.mxu1 %v334_v46 }
  0x5c   : > { %764 = vmatprep.mubr.msk.f32.mxu0 %vm359_vm0, %v329_v47  ;;  %768 = vmatprep.mubr.msk.f32.mxu1 %vm359_vm0, %v337_v48 }
  0x5f   : > { %463 = vmatmul.mubr.f32.gmra.mxu0 %v328_v49  ;;  %483 = vmatmul.mubr.f32.gmra.mxu1 %v336_v50 }
  0x60   : > { %765 = vmatprep.mubr.msk.f32.mxu0 %vm359_vm0, %v331_v51  ;;  %769 = vmatprep.mubr.msk.f32.mxu1 %vm359_vm0, %v339_v52 }
  0x63   : > { %468 = vmatmul.mubr.f32.gmra.mxu0 %v330_v53  ;;  %488 = vmatmul.mubr.f32.gmra.mxu1 %v338_v54 }
 0x117   : > { %v454_v55 = vpop.f32.mrf.mxu0  ;;  %v474_v56 = vpop.f32.mrf.mxu1 }
 0x118   : > { %493 = vst [vmem:[%s1096_s28] sm:$0xff] %v454_v55  ;;  %497 = vst [vmem:[%s1096_s28 + $0x20] sm:$0xff] %v474_v56  ;;  %501 = vadd.xlane.f32.xlu0 %v454_v55  ;;  %v526_v0 = vmul.f32 %v454_v55, %v454_v55  ;;  %v530_v5 = vmul.f32 %v474_v56, %v474_v56 }
 0x119   : > { %v456_v57 = vpop.f32.mrf.mxu0  ;;  %v476_v58 = vpop.f32.mrf.mxu1 }
 0x11b   : > { %v459_v59 = vpop.f32.mrf.mxu0  ;;  %v479_v60 = vpop.f32.mrf.mxu1 }
 0x11c   : > { %494 = vst [vmem:[%s1096_s28 + $0x8] sm:$0xff] %v459_v59  ;;  %498 = vst [vmem:[%s1096_s28 + $0x28] sm:$0xff] %v479_v60  ;;  %511 = vadd.xlane.f32.xlu1 %v479_v60  ;;  %509 = vadd.xlane.f32.xlu0 %v474_v56  ;;  %v527_v61 = vmul.f32 %v459_v59, %v459_v59  ;;  %v531_v6 = vmul.f32 %v479_v60, %v479_v60 }
 0x11d   : > { %v461_v62 = vpop.f32.mrf.mxu0  ;;  %v481_v63 = vpop.f32.mrf.mxu1 }
 0x11f   : > { %v464_v1 = vpop.f32.mrf.mxu0  ;;  %v484_v2 = vpop.f32.mrf.mxu1  ;;  %v619_v31 = vld [vmem:[%s1096_s28] sm:$0xff] (%p922_p5) }
 0x120   : > { %534 = vadd.xlane.f32.xlu0 %v526_v0  ;;  %536 = vadd.xlane.f32.xlu1 %v527_v61  ;;  %495 = vst [vmem:[%s1096_s28 + $0x10] sm:$0xff] %v464_v1  ;;  %499 = vst [vmem:[%s1096_s28 + $0x30] sm:$0xff] %v484_v2  ;;  %v528_v11 = vmul.f32 %v464_v1, %v464_v1  ;;  %v532_v12 = vmul.f32 %v484_v2, %v484_v2  ;;  %v627_v35 = vld [vmem:[%s1096_s28 + $0x20] sm:$0xff] (%p922_p5) }
 0x121   : > { %v466_v3 = vpop.f32.mrf.mxu0  ;;  %v486_v4 = vpop.f32.mrf.mxu1  ;;  %620 = vst [vmem:[%s576_s13] sm:$0xff] (%p922_p5), %v619_v31  ;;  %628 = vst [vmem:[%s576_s13 + $0x80] sm:$0xff] (%p922_p5), %v627_v35 }
 0x123   : > { %v469_v7 = vpop.f32.mrf.mxu0  ;;  %v489_v8 = vpop.f32.mrf.mxu1  ;;  %v621_v32 = vld [vmem:[%s1096_s28 + $0x8] sm:$0xff] (%p922_p5) }
 0x124   : > { %542 = vadd.xlane.f32.xlu0 %v530_v5  ;;  %544 = vadd.xlane.f32.xlu1 %v531_v6  ;;  %496 = vst [vmem:[%s1096_s28 + $0x18] sm:$0xff] %v469_v7  ;;  %500 = vst [vmem:[%s1096_s28 + $0x38] sm:$0xff] %v489_v8  ;;  %v529_v13 = vmul.f32 %v469_v7, %v469_v7  ;;  %v533_v14 = vmul.f32 %v489_v8, %v489_v8  ;;  %v629_v36 = vld [vmem:[%s1096_s28 + $0x28] sm:$0xff] (%p922_p5) }
 0x125   : > { %v471_v9 = vpop.f32.mrf.mxu0  ;;  %v491_v10 = vpop.f32.mrf.mxu1  ;;  %622 = vst [vmem:[%s576_s13 + $0x20] sm:$0xff] (%p922_p5), %v621_v32  ;;  %630 = vst [vmem:[%s576_s13 + $0xa0] sm:$0xff] (%p922_p5), %v629_v36 }
 0x127   : > { %v623_v33 = vld [vmem:[%s1096_s28 + $0x10] sm:$0xff] (%p922_p5) }
 0x128   : > { %503 = vadd.xlane.f32.xlu0 %v459_v59  ;;  %505 = vadd.xlane.f32.xlu1 %v464_v1  ;;  %624 = vst [vmem:[%s576_s13 + $0x40] sm:$0xff] (%p922_p5), %v623_v33  ;;  %v631_v37 = vld [vmem:[%s1096_s28 + $0x30] sm:$0xff] (%p922_p5) }
 0x129   : > { %632 = vst [vmem:[%s576_s13 + $0xc0] sm:$0xff] (%p922_p5), %v631_v37 }
 0x12b   : > { %v625_v34 = vld [vmem:[%s1096_s28 + $0x18] sm:$0xff] (%p922_p5) }
 0x12c   : > { %513 = vadd.xlane.f32.xlu0 %v484_v2  ;;  %507 = vadd.xlane.f32.xlu1 %v469_v7  ;;  %626 = vst [vmem:[%s576_s13 + $0x60] sm:$0xff] (%p922_p5), %v625_v34  ;;  %v633_v38 = vld [vmem:[%s1096_s28 + $0x38] sm:$0xff] (%p922_p5) }
 0x12d   : > { %634 = vst [vmem:[%s576_s13 + $0xe0] sm:$0xff] (%p922_p5), %v633_v38 }
 0x130   : > { %538 = vadd.xlane.f32.xlu0 %v528_v11  ;;  %515 = vadd.xlane.f32.xlu1 %v489_v8 }
 0x134   : > { %546 = vadd.xlane.f32.xlu0 %v532_v12  ;;  %540 = vadd.xlane.f32.xlu1 %v529_v13 }
 0x138   : > { %548 = vadd.xlane.f32.xlu1 %v533_v14 }
 0x1a1   : > { %v502_v15 = vpop.xlane.xlu0 %501 }
 0x1a2   : > { %518 = vst.msk [vmem:[%s318_s6] sm:$0xff] %vm517_vm2, %v502_v15 }
 0x1a5   : > { %v512_v16 = vpop.xlane.xlu1 %511  ;;  %v510_v17 = vpop.xlane.xlu0 %509 }
 0x1a6   : > { %523 = vst.msk [vmem:[%s318_s6 + $0x28] sm:$0xff] %vm517_vm2, %v512_v16  ;;  %522 = vst.msk [vmem:[%s318_s6 + $0x20] sm:$0xff] %vm517_vm2, %v510_v17 }
 0x1a9   : > { %v535_v18 = vpop.xlane.xlu0 %534  ;;  %v537_v19 = vpop.xlane.xlu1 %536 }
 0x1aa   : > { %550 = vst.msk [vmem:[%s323_s9] sm:$0xff] %vm517_vm2, %v535_v18  ;;  %551 = vst.msk [vmem:[%s323_s9 + $0x8] sm:$0xff] %vm517_vm2, %v537_v19 }
 0x1ad   : > { %v543_v20 = vpop.xlane.xlu0 %542  ;;  %v545_v21 = vpop.xlane.xlu1 %544 }
 0x1ae   : > { %554 = vst.msk [vmem:[%s323_s9 + $0x20] sm:$0xff] %vm517_vm2, %v543_v20  ;;  %555 = vst.msk [vmem:[%s323_s9 + $0x28] sm:$0xff] %vm517_vm2, %v545_v21 }
 0x1b1   : > { %v504_v22 = vpop.xlane.xlu0 %503  ;;  %v506_v23 = vpop.xlane.xlu1 %505 }
 0x1b2   : > { %519 = vst.msk [vmem:[%s318_s6 + $0x8] sm:$0xff] %vm517_vm2, %v504_v22  ;;  %520 = vst.msk [vmem:[%s318_s6 + $0x10] sm:$0xff] %vm517_vm2, %v506_v23 }
 0x1b5   : > { %v514_v24 = vpop.xlane.xlu0 %513  ;;  %v508_v25 = vpop.xlane.xlu1 %507 }
 0x1b6   : > { %524 = vst.msk [vmem:[%s318_s6 + $0x30] sm:$0xff] %vm517_vm2, %v514_v24  ;;  %521 = vst.msk [vmem:[%s318_s6 + $0x18] sm:$0xff] %vm517_vm2, %v508_v25 }
 0x1b9   : > { %v539_v26 = vpop.xlane.xlu0 %538  ;;  %v516_v27 = vpop.xlane.xlu1 %515 }
 0x1ba   : > { %552 = vst.msk [vmem:[%s323_s9 + $0x10] sm:$0xff] %vm517_vm2, %v539_v26  ;;  %525 = vst.msk [vmem:[%s318_s6 + $0x38] sm:$0xff] %vm517_vm2, %v516_v27 }
 0x1bd   : > { %v547_v28 = vpop.xlane.xlu0 %546  ;;  %v541_v29 = vpop.xlane.xlu1 %540 }
 0x1be   : > { %556 = vst.msk [vmem:[%s323_s9 + $0x30] sm:$0xff] %vm517_vm2, %v547_v28  ;;  %553 = vst.msk [vmem:[%s323_s9 + $0x18] sm:$0xff] %vm517_vm2, %v541_v29  ;;  %574 = sbr.rel (!%p922_p5) target bundleno = 451 (0x1c3), region = 70 }
 0x1c1   : > { %v549_v30 = vpop.xlane.xlu1 %548 }
 0x1c2   : > { %557 = vst.msk [vmem:[%s323_s9 + $0x38] sm:$0xff] %vm517_vm2, %v549_v30 }
 0x1c3 PF: > { %p12_p11 = scmp.ge.s32.totalorder %s910_s19, 6   ;;  %s1160_s15 = smov %s859_s16 }
 0x1c4   : > { %s1161_s16 = smov %s920_s22  ;;  %s1162_s17 = smov %s910_s19 }
 0x1c5   :  { %14 = sbr.rel (!%p12_p11) target bundleno = 2 (0x2), region = 163 }

// kernel: convembed_forward.5
= control target key start
LH: loop header
LB: loop body
LE: loop exit
PB: predicated region body
PF: predicated region fallthrough
CT: control target
= control target key end

     0   :  { %s904_s18 = smov 0   ;;  %s906_s19 = smov 0   ;;  %s1339_s0 = inlined_call_operand.vmem [shape: f32[64,512], index: 0, kind: input, shape index: {}]   ;;  %s1340_s1 = inlined_call_operand.vmem [shape: f32[4,64,1], index: 1, kind: input, shape index: {}]   ;;  %s1341_s2 = inlined_call_operand.vmem [shape: f32[4,64,1], index: 2, kind: input, shape index: {}]   ;;  %s1342_s3 = inlined_call_operand.vmem [shape: f32[64,1], index: 3, kind: input, shape index: {}]   ;;  %s1343_s4 = inlined_call_operand.vmem [shape: f32[64,1], index: 4, kind: input, shape index: {}]   ;;  %s1344_s5 = inlined_call_operand.vmem [shape: f32[64,512], index: 5, kind: output, shape index: {}]  }
   0x1   :  { %s908_s20 = smov 0  }
   0x2 LB: > { %s793_s21 = sadd.s32 4294967295, %s871_s20   ;;  %s921_s22 = sadd.s32 1, %s871_s20   ;;  %s871_s20 = sphi %s908_s20, %s1348_s20   ;;  %s867_s19 = sphi %s906_s19, %s1347_s19   ;;  %s863_s18 = sphi %s904_s18, %s1346_s18  }
   0x3   : > { %s19_s23 = ssub.s32 %s871_s20, %s921_s22  ;;  %s22_s24 = sadd.s32 1, %s867_s19 }
   0x4   : > { %p20_p0 = scmp.eq.s32.totalorder %s19_s23, 0  ;;  %p29_p1 = scmp.ne.s32.totalorder %s867_s19, %s863_s18 }
   0x5   : > { %p30_p2 = scmp.eq.s32.totalorder %s871_s20, 0  ;;  %p143_p3 = scmp.eq.s32.totalorder %s793_s21, 3 }
   0x6   : > { %s932_s25 = scalar_select %p20_p0, %s867_s19, %s22_s24  }
   0x7   : > { %p31_p4 = por %p30_p2, %p29_p1  ;;  %p934_p5 = por %p143_p3, %p29_p1 }
   0x8   : > { %p796_p6 = scmp.ge.s32.totalorder %s871_s20, 4 }
   0xa   : > { %177 = sbr.rel (%p796_p6) target bundleno = 27 (0x1b), region = 32 }
   0xf   : > { %180 = sbr.rel (!%p31_p4) target bundleno = 27 (0x1b), region = 36  ;;  %s182_s27 = sand.u32 (%p31_p4), 1, %s867_s19  }
  0x10   : > { %s798_s28 = sshll.u32 (%p31_p4), %s871_s20, 3  ;;  %s797_s29 = sshll.u32 (%p31_p4), %s182_s27, 6 }
  0x11   : > { %s186_s7 = scalar_lea.vmem (%p31_p4), %s1339_s0, %s798_s28  ;;  %s184_s8 = scalar_lea.vmem (%p31_p4), [#allocation2], %s797_s29 }
  0x12   : > { %v229_v0 = vld [vmem:[%s186_s7] sm:$0xff] (%p31_p4) }
  0x13   : > { %v231_v1 = vld [vmem:[%s186_s7 + $0x20] sm:$0xff] (%p31_p4)  ;;  %230 = vst [vmem:[%s184_s8] sm:$0xff] (%p31_p4), %v229_v0 }
  0x14   : > { %v233_v2 = vld [vmem:[%s186_s7 + $0x40] sm:$0xff]  ;;  %232 = vst [vmem:[%s184_s8 + $0x8] sm:$0xff] %v231_v1 }
  0x15   : > { %234 = vst [vmem:[%s184_s8 + $0x10] sm:$0xff] %v233_v2  ;;  %v235_v3 = vld [vmem:[%s186_s7 + $0x60] sm:$0xff] }
  0x16   : > { %v237_v4 = vld [vmem:[%s186_s7 + $0x80] sm:$0xff]  ;;  %236 = vst [vmem:[%s184_s8 + $0x18] sm:$0xff] %v235_v3 }
  0x17   : > { %v239_v5 = vld [vmem:[%s186_s7 + $0xa0] sm:$0xff]  ;;  %238 = vst [vmem:[%s184_s8 + $0x20] sm:$0xff] %v237_v4 }
  0x18   : > { %240 = vst [vmem:[%s184_s8 + $0x28] sm:$0xff] %v239_v5  ;;  %v241_v6 = vld [vmem:[%s186_s7 + $0xc0] sm:$0xff] }
  0x19   : > { %v243_v7 = vld [vmem:[%s186_s7 + $0xe0] sm:$0xff]  ;;  %242 = vst [vmem:[%s184_s8 + $0x30] sm:$0xff] %v241_v6 }
  0x1a   : > { %244 = vst [vmem:[%s184_s8 + $0x38] sm:$0xff] %v243_v7 }
  0x1b PF: > { %p799_p7 = scmp.ge.s32.totalorder %s871_s20, 1  ;;  %p249_p8 = scmp.lt.s32.totalorder %s871_s20, 5 }
  0x1d   : > { %p250_p9 = pnand %p799_p7, %p249_p8 }
  0x1e   : > { %s256_s7 = sand.u32 (!%p250_p9), 1, %s863_s18  }
  0x1f   : > { %253 = sbr.rel (%p250_p9) target bundleno = 255 (0xff), region = 74  ;;  %s800_s8 = sshll.u32 (!%p250_p9), %s256_s7, 6 }
  0x20   : > { %s1294_s9 = scalar_lea.vmem (!%p250_p9), [#allocation2], %s800_s8  ;;  %s1300_s18 = scalar_lea.vmem (!%p250_p9), [#allocation3], %s800_s8 }
  0x24   : > { %v284_v8 = vld [vmem:[%s1340_s1 + $0x10] sm:$0xff]  ;;  %vm314_vm0 = vcmask 7168   ;;  %v873_v11 = vmov 0   ;;  %v282_v27 = vld [vmem:[%s1340_s1] sm:$0xff]  ;;  %v285_v47 = vld [vmem:[%s1340_s1 + $0x18] sm:$0xff]  ;;  %s803_s10 = sshll.u32 (%p934_p5), %s793_s21, 3 }
  0x25   : > { %v292_v9 = vld [vmem:[%s1340_s1 + $0x50] sm:$0xff]  ;;  %832 = vset.pattern.permute.xlu1 %v873_v11  ;;  %831 = vset.pattern.permute.xlu0 %v873_v11  ;;  %v329_v13 = vsel %vm314_vm0, %v284_v8, 0.0  ;;  %v290_v28 = vld [vmem:[%s1340_s1 + $0x40] sm:$0xff]  ;;  %v315_v32 = vsel %vm314_vm0, %v282_v27, 0.0  ;;  %v293_v48 = vld [vmem:[%s1340_s1 + $0x58] sm:$0xff]  ;;  %v336_v54 = vsel %vm314_vm0, %v285_v47, 0.0  ;;  %s675_s13 = scalar_lea.vmem (%p934_p5), %s1344_s5, %s803_s10 }
  0x26   : > { %v300_v10 = vld [vmem:[%s1340_s1 + $0x90] sm:$0xff]  ;;  %v330_v14 = vsel %vm314_vm0, %v292_v9, 0.0  ;;  %v298_v29 = vld [vmem:[%s1340_s1 + $0x80] sm:$0xff]  ;;  %v316_v33 = vsel %vm314_vm0, %v290_v28, 0.0  ;;  %v301_v49 = vld [vmem:[%s1340_s1 + $0x98] sm:$0xff]  ;;  %v337_v58 = vsel %vm314_vm0, %v293_v48, 0.0 }
  0x27   : > { %v308_v12 = vld [vmem:[%s1340_s1 + $0xd0] sm:$0xff]  ;;  %v332_v15 = vsel %vm314_vm0, %v300_v10, 0.0  ;;  %v331_v18 = vadd.f32 %v330_v14, %v329_v13  ;;  %v306_v31 = vld [vmem:[%s1340_s1 + $0xc0] sm:$0xff]  ;;  %v318_v34 = vsel %vm314_vm0, %v298_v29, 0.0  ;;  %v317_v38 = vadd.f32 %v316_v33, %v315_v32  ;;  %v309_v53 = vld [vmem:[%s1340_s1 + $0xd8] sm:$0xff] }
  0x28   : > { %v373_v16 = vld [vmem:[%s1341_s2 + $0x10] sm:$0xff]  ;;  %v334_v23 = vsel %vm314_vm0, %v308_v12, 0.0  ;;  %v371_v35 = vld [vmem:[%s1341_s2] sm:$0xff]  ;;  %v320_v39 = vsel %vm314_vm0, %v306_v31, 0.0  ;;  %v374_v55 = vld [vmem:[%s1341_s2 + $0x18] sm:$0xff]  ;;  %v339_v59 = vsel %vm314_vm0, %v301_v49, 0.0  ;;  %v338_v1 = vadd.f32 %v337_v58, %v336_v54 }
  0x29   : > { %v381_v17 = vld [vmem:[%s1341_s2 + $0x50] sm:$0xff]  ;;  %v417_v21 = vsel %vm314_vm0, %v373_v16, 0.0  ;;  %v333_v30 = vadd.f32 %v332_v15, %v331_v18  ;;  %v379_v36 = vld [vmem:[%s1341_s2 + $0x40] sm:$0xff]  ;;  %v403_v42 = vsel %vm314_vm0, %v371_v35, 0.0  ;;  %v319_v51 = vadd.f32 %v318_v34, %v317_v38  ;;  %v382_v56 = vld [vmem:[%s1341_s2 + $0x58] sm:$0xff] }
  0x2a   : > { %v389_v19 = vld [vmem:[%s1341_s2 + $0x90] sm:$0xff]  ;;  %v418_v22 = vsel %vm314_vm0, %v381_v17, 0.0  ;;  %v387_v40 = vld [vmem:[%s1341_s2 + $0x80] sm:$0xff]  ;;  %v404_v44 = vsel %vm314_vm0, %v379_v36, 0.0  ;;  %v341_v60 = vsel %vm314_vm0, %v309_v53, 0.0  ;;  %v390_v61 = vld [vmem:[%s1341_s2 + $0x98] sm:$0xff]  ;;  %v340_v11 = vadd.f32 %v339_v59, %v338_v1 }
  0x2b   : > { %v397_v20 = vld [vmem:[%s1341_s2 + $0xd0] sm:$0xff]  ;;  %v419_v24 = vadd.f32 %v418_v22, %v417_v21  ;;  %v420_v25 = vsel %vm314_vm0, %v389_v19, 0.0  ;;  %v395_v41 = vld [vmem:[%s1341_s2 + $0xc0] sm:$0xff]  ;;  %v335_v43 = vadd.f32 %v334_v23, %v333_v30  ;;  %v406_v45 = vsel %vm314_vm0, %v387_v40, 0.0  ;;  %v398_v2 = vld [vmem:[%s1341_s2 + $0xd8] sm:$0xff] }
  0x2c   : > { %v422_v26 = vsel %vm314_vm0, %v397_v20, 0.0  ;;  %v408_v46 = vsel %vm314_vm0, %v395_v41, 0.0  ;;  %v405_v52 = vadd.f32 %v404_v44, %v403_v42  ;;  %v321_v63 = vadd.f32 %v320_v39, %v319_v51  ;;  %v283_v3 = vld [vmem:[%s1340_s1 + $0x8] sm:$0xff] }
  0x2d   : > { %v421_v37 = vadd.f32 %v420_v25, %v419_v24  ;;  %v1029_v57 = vmul.f32 0.001953125, %v335_v43  ;;  %v291_v4 = vld [vmem:[%s1340_s1 + $0x48] sm:$0xff]  ;;  %v424_v6 = vsel %vm314_vm0, %v374_v55, 0.0  ;;  %v425_v7 = vsel %vm314_vm0, %v382_v56, 0.0 }
  0x2e   : > { %v407_v0 = vadd.f32 %v406_v45, %v405_v52  ;;  %v427_v8 = vsel %vm314_vm0, %v390_v61, 0.0  ;;  %v1051_v10 = vmul.f32 0.001953125, %v321_v63  ;;  %v426_v12 = vadd.f32 %v425_v7, %v424_v6  ;;  %v299_v13 = vld [vmem:[%s1340_s1 + $0x88] sm:$0xff] }
  0x2f   : > { %v423_v50 = vadd.f32 %v422_v26, %v421_v37  ;;  %v477_v5 = vmul.f32 %v1029_v57, %v1029_v57  ;;  %v307_v14 = vld [vmem:[%s1340_s1 + $0xc8] sm:$0xff]  ;;  %v429_v16 = vsel %vm314_vm0, %v398_v2, 0.0  ;;  %v322_v17 = vsel %vm314_vm0, %v283_v3, 0.0  ;;  %v294_v3 = vld [vmem:[%s1340_s1 + $0x60] sm:$0xff] }
  0x30   : > { %v409_v9 = vadd.f32 %v408_v46, %v407_v0  ;;  %v323_v18 = vsel %vm314_vm0, %v291_v4, 0.0  ;;  %v372_v19 = vld [vmem:[%s1341_s2 + $0x8] sm:$0xff]  ;;  %v475_v21 = vmul.f32 %v1051_v10, %v1051_v10  ;;  %v342_v22 = vadd.f32 %v341_v60, %v340_v11  ;;  %v302_v4 = vld [vmem:[%s1340_s1 + $0xa0] sm:$0xff] }
  0x31   : > { %v469_v62 = vmul.f32 0.001953125, %v423_v50  ;;  %v428_v23 = vadd.f32 %v427_v8, %v426_v12  ;;  %v380_v24 = vld [vmem:[%s1341_s2 + $0x48] sm:$0xff]  ;;  %v324_v27 = vadd.f32 %v323_v18, %v322_v17  ;;  %v325_v28 = vsel %vm314_vm0, %v299_v13, 0.0  ;;  %v375_v11 = vld [vmem:[%s1341_s2 + $0x20] sm:$0xff] }
  0x32   : > { %v467_v20 = vmul.f32 0.001953125, %v409_v9  ;;  %v388_v25 = vld [vmem:[%s1341_s2 + $0x88] sm:$0xff]  ;;  %v327_v29 = vsel %vm314_vm0, %v307_v14, 0.0  ;;  %v1075_v32 = vmul.f32 0.001953125, %v342_v22  ;;  %v410_v34 = vsel %vm314_vm0, %v372_v19, 0.0  ;;  %v399_v17 = vld [vmem:[%s1341_s2 + $0xe0] sm:$0xff] }
  0x33   : > { %v485_v15 = vsub.f32 %v469_v62, %v477_v5  ;;  %v430_v31 = vadd.f32 %v429_v16, %v428_v23  ;;  %v396_v33 = vld [vmem:[%s1341_s2 + $0xc8] sm:$0xff]  ;;  %v326_v37 = vadd.f32 %v325_v28, %v324_v27  ;;  %v411_v38 = vsel %vm314_vm0, %v380_v24, 0.0  ;;  %v286_v62 = vld [vmem:[%s1340_s1 + $0x20] sm:$0xff]  ;;  %v297_v27 = vld [vmem:[%s1340_s1 + $0x78] sm:$0xff] }
  0x34   : > { %v483_v30 = vsub.f32 %v467_v20, %v475_v21  ;;  %v287_v35 = vld [vmem:[%s1340_s1 + $0x28] sm:$0xff]  ;;  %v413_v39 = vsel %vm314_vm0, %v388_v25, 0.0  ;;  %v478_v42 = vmul.f32 %v1075_v32, %v1075_v32  ;;  %v412_v43 = vadd.f32 %v411_v38, %v410_v34  ;;  %v310_v5 = vld [vmem:[%s1340_s1 + $0xe0] sm:$0xff]  ;;  %v305_v28 = vld [vmem:[%s1340_s1 + $0xb8] sm:$0xff] }
  0x35   : > { %v493_v26 = vadd.f32 1e-05, %v485_v15  ;;  %v295_v36 = vld [vmem:[%s1340_s1 + $0x68] sm:$0xff]  ;;  %v470_v41 = vmul.f32 0.001953125, %v430_v31  ;;  %v328_v47 = vadd.f32 %v327_v29, %v326_v37  ;;  %v415_v48 = vsel %vm314_vm0, %v396_v33, 0.0  ;;  %v383_v15 = vld [vmem:[%s1341_s2 + $0x60] sm:$0xff] }
  0x36   : > { %v491_v40 = vadd.f32 1e-05, %v483_v30  ;;  %v303_v44 = vld [vmem:[%s1340_s1 + $0xa8] sm:$0xff]  ;;  %v350_v49 = vsel %vm314_vm0, %v287_v35, 0.0  ;;  %v351_v50 = vsel %vm314_vm0, %v295_v36, 0.0  ;;  %v414_v53 = vadd.f32 %v413_v39, %v412_v43  ;;  %v391_v16 = vld [vmem:[%s1341_s2 + $0xa0] sm:$0xff] }
  0x37   : > { %833 = vrsqrt.f32 %v493_v26  ;;  %v311_v45 = vld [vmem:[%s1340_s1 + $0xe8] sm:$0xff]  ;;  %v486_v52 = vsub.f32 %v470_v41, %v478_v42  ;;  %v352_v54 = vadd.f32 %v351_v50, %v350_v49  ;;  %v1112_v58 = vmul.f32 0.001953125, %v328_v47  ;;  %v289_v26 = vld [vmem:[%s1340_s1 + $0x38] sm:$0xff]  ;;  %v509_v34 = vld [vmem:[%s1342_s3 + $0x10] sm:$0xff] }
  0x38   : > { %v376_v46 = vld [vmem:[%s1341_s2 + $0x28] sm:$0xff]  ;;  %835 = vrsqrt.f32 %v491_v40  ;;  %v353_v59 = vsel %vm314_vm0, %v303_v44, 0.0  ;;  %v355_v60 = vsel %vm314_vm0, %v311_v45, 0.0  ;;  %v416_v0 = vadd.f32 %v415_v48, %v414_v53  ;;  %v313_v39 = vld [vmem:[%s1340_s1 + $0xf8] sm:$0xff] }
  0x39   : > { %v384_v51 = vld [vmem:[%s1341_s2 + $0x68] sm:$0xff]  ;;  %v438_v61 = vsel %vm314_vm0, %v376_v46, 0.0  ;;  %v494_v63 = vadd.f32 1e-05, %v486_v52  ;;  %v354_v1 = vadd.f32 %v353_v59, %v352_v54  ;;  %v476_v6 = vmul.f32 %v1112_v58, %v1112_v58  ;;  %v378_v40 = vld [vmem:[%s1341_s2 + $0x38] sm:$0xff]  ;;  %v507_v52 = vld [vmem:[%s1342_s3] sm:$0xff] }
  0x3a   : > { %v392_v55 = vld [vmem:[%s1341_s2 + $0xa8] sm:$0xff]  ;;  %v439_v2 = vsel %vm314_vm0, %v384_v51, 0.0  ;;  %v468_v12 = vmul.f32 0.001953125, %v416_v0  ;;  %v343_v14 = vsel %vm314_vm0, %v286_v62, 0.0  ;;  %v344_v19 = vsel %vm314_vm0, %v294_v3, 0.0  ;;  %v386_v45 = vld [vmem:[%s1341_s2 + $0x78] sm:$0xff] }
  0x3b   : > { %v400_v56 = vld [vmem:[%s1341_s2 + $0xe8] sm:$0xff]  ;;  %v440_v7 = vadd.f32 %v439_v2, %v438_v61  ;;  %v441_v8 = vsel %vm314_vm0, %v392_v55, 0.0  ;;  %837 = vrsqrt.f32 %v494_v63  ;;  %v356_v13 = vadd.f32 %v355_v60, %v354_v1  ;;  %v394_v50 = vld [vmem:[%s1341_s2 + $0xb8] sm:$0xff]  ;;  %v288_v63 = vld [vmem:[%s1340_s1 + $0x30] sm:$0xff] }
  0x3c   : > { %v443_v9 = vsel %vm314_vm0, %v400_v56, 0.0  ;;  %v346_v20 = vsel %vm314_vm0, %v302_v4, 0.0  ;;  %v348_v21 = vsel %vm314_vm0, %v310_v5, 0.0  ;;  %v484_v22 = vsub.f32 %v468_v12, %v476_v6  ;;  %v402_v61 = vld [vmem:[%s1341_s2 + $0xf8] sm:$0xff]  ;;  %v296_v4 = vld [vmem:[%s1340_s1 + $0x70] sm:$0xff] }
  0x3d   : > { %v442_v18 = vadd.f32 %v441_v8, %v440_v7  ;;  %v1150_v23 = vmul.f32 0.001953125, %v356_v13  ;;  %v345_v24 = vadd.f32 %v344_v19, %v343_v14  ;;  %v431_v25 = vsel %vm314_vm0, %v375_v11, 0.0  ;;  %v312_v11 = vld [vmem:[%s1340_s1 + $0xf0] sm:$0xff]  ;;  %v510_v12 = vld [vmem:[%s1342_s3 + $0x18] sm:$0xff] }
  0x3e   : > { %v432_v30 = vsel %vm314_vm0, %v383_v15, 0.0  ;;  %v434_v31 = vsel %vm314_vm0, %v391_v16, 0.0  ;;  %v436_v33 = vsel %vm314_vm0, %v399_v17, 0.0  ;;  %v492_v35 = vadd.f32 1e-05, %v484_v22  ;;  %v377_v16 = vld [vmem:[%s1341_s2 + $0x30] sm:$0xff] }
  0x3f   : > { %v444_v29 = vadd.f32 %v443_v9, %v442_v18  ;;  %v480_v36 = vmul.f32 %v1150_v23, %v1150_v23  ;;  %v347_v37 = vadd.f32 %v346_v20, %v345_v24  ;;  %v433_v38 = vadd.f32 %v432_v30, %v431_v25  ;;  %v304_v9 = vld [vmem:[%s1340_s1 + $0xb0] sm:$0xff] }
  0x40   : > { %v364_v42 = vsel %vm314_vm0, %v289_v26, 0.0  ;;  %v365_v43 = vsel %vm314_vm0, %v297_v27, 0.0  ;;  %v367_v44 = vsel %vm314_vm0, %v305_v28, 0.0  ;;  %839 = vrsqrt.f32 %v492_v35  ;;  %v385_v20 = vld [vmem:[%s1341_s2 + $0x70] sm:$0xff] }
  0x41   : > { %v472_v41 = vmul.f32 0.001953125, %v444_v29  ;;  %v349_v47 = vadd.f32 %v348_v21, %v347_v37  ;;  %v435_v48 = vadd.f32 %v434_v31, %v433_v38  ;;  %v366_v49 = vadd.f32 %v365_v43, %v364_v42  ;;  %v393_v21 = vld [vmem:[%s1341_s2 + $0xb0] sm:$0xff] }
  0x42   : > { %v369_v54 = vsel %vm314_vm0, %v313_v39, 0.0  ;;  %v452_v55 = vsel %vm314_vm0, %v378_v40, 0.0  ;;  %v453_v62 = vsel %vm314_vm0, %v386_v45, 0.0  ;;  %v455_v3 = vsel %vm314_vm0, %v394_v50, 0.0  ;;  %v401_v31 = vld [vmem:[%s1341_s2 + $0xf0] sm:$0xff]  ;;  %v508_v39 = vld [vmem:[%s1342_s3 + $0x8] sm:$0xff] }
  0x43   : > { %v488_v53 = vsub.f32 %v472_v41, %v480_v36  ;;  %v437_v56 = vadd.f32 %v436_v33, %v435_v48  ;;  %v1192_v59 = vmul.f32 0.001953125, %v349_v47  ;;  %v368_v60 = vadd.f32 %v367_v44, %v366_v49  ;;  %v512_v50 = vld [vmem:[%s1342_s3 + $0x28] sm:$0xff] }
  0x44   : > { %v834_v46 = vpop.eup %833  ;;  %v454_v2 = vadd.f32 %v453_v62, %v452_v55  ;;  %v457_v14 = vsel %vm314_vm0, %v402_v61, 0.0  ;;  %v357_v15 = vsel %vm314_vm0, %v288_v63, 0.0  ;;  %v358_v19 = vsel %vm314_vm0, %v296_v4, 0.0  ;;  %v514_v63 = vld [vmem:[%s1342_s3 + $0x38] sm:$0xff] }
  0x45   : > { %v1185_v51 = vmul.f32 %v834_v46, %v509_v34  ;;  %v836_v0 = vpop.eup %835  ;;  %v496_v1 = vadd.f32 1e-05, %v488_v53  ;;  %v471_v6 = vmul.f32 0.001953125, %v437_v56  ;;  %v479_v7 = vmul.f32 %v1192_v59, %v1192_v59 }
  0x46   : > { %v1206_v5 = vmul.f32 %v836_v0, %v507_v52  ;;  %v370_v8 = vadd.f32 %v369_v54, %v368_v60  ;;  %v456_v13 = vadd.f32 %v455_v3, %v454_v2  ;;  %v359_v25 = vadd.f32 %v358_v19, %v357_v15  ;;  %v511_v60 = vld [vmem:[%s1342_s3 + $0x20] sm:$0xff]  ;;  %v524_v2 = vld [vmem:[%s1343_s4 + $0x8] sm:$0xff] }
  0x47   : > { %567 = vperm.xlu1 %832, %v1185_v51   ;;  %841 = vrsqrt.f32 %v496_v1  ;;  %v487_v17 = vsub.f32 %v471_v6, %v479_v7  ;;  %v360_v26 = vsel %vm314_vm0, %v304_v9, 0.0  ;;  %v362_v27 = vsel %vm314_vm0, %v312_v11, 0.0  ;;  %v526_v7 = vld [vmem:[%s1343_s4 + $0x18] sm:$0xff]  ;;  %v523_v11 = vld [vmem:[%s1343_s4] sm:$0xff] }
  0x48   : > { %557 = vperm.xlu0 %831, %v1206_v5   ;;  %v1225_v18 = vmul.f32 0.001953125, %v370_v8  ;;  %v838_v22 = vpop.eup %837  ;;  %v458_v24 = vadd.f32 %v457_v14, %v456_v13  ;;  %v445_v33 = vsel %vm314_vm0, %v377_v16, 0.0  ;;  %v361_v35 = vadd.f32 %v360_v26, %v359_v25  ;;  %v513_v8 = vld [vmem:[%s1342_s3 + $0x30] sm:$0xff]  ;;  %v528_v14 = vld [vmem:[%s1343_s4 + $0x28] sm:$0xff] }
  0x49   : > { %v518_v28 = vmul.f32 %v838_v22, %v510_v12  ;;  %v495_v29 = vadd.f32 1e-05, %v487_v17  ;;  %v446_v36 = vsel %vm314_vm0, %v385_v20, 0.0  ;;  %v448_v37 = vsel %vm314_vm0, %v393_v21, 0.0 }
  0x4a   : > { %v482_v30 = vmul.f32 %v1225_v18, %v1225_v18  ;;  %v474_v34 = vmul.f32 0.001953125, %v458_v24  ;;  %v447_v38 = vadd.f32 %v446_v36, %v445_v33  ;;  %v363_v41 = vadd.f32 %v362_v27, %v361_v35 }
  0x4b   : > { %572 = vperm.xlu1 %832, %v518_v28   ;;  %843 = vrsqrt.f32 %v495_v29  ;;  %v450_v42 = vsel %vm314_vm0, %v401_v31, 0.0  ;;  %v534_v6 = vmul.f32 %v518_v28, %v1075_v32  ;;  %v533_v15 = vmul.f32 %v1185_v51, %v1029_v57  ;;  %v527_v57 = vld [vmem:[%s1343_s4 + $0x20] sm:$0xff]  ;;  %v548_v29 = vld [vmem:[%s1294_s9 + $0x8] sm:$0xff] }
  0x4c   : > { %v490_v40 = vsub.f32 %v474_v34, %v482_v30  ;;  %v449_v43 = vadd.f32 %v448_v37, %v447_v38  ;;  %v465_v46 = vmul.f32 0.001953125, %v363_v41  ;;  %v550_v34 = vld [vmem:[%s1294_s9 + $0x18] sm:$0xff]  ;;  %v547_v37 = vld [vmem:[%s1294_s9] sm:$0xff]  ;;  %v552_v41 = vld [vmem:[%s1294_s9 + $0x28] sm:$0xff] }
  0x4d   : > { %v840_v44 = vpop.eup %839  ;;  %v542_v12 = vsub.f32 %v526_v7, %v534_v6 }
  0x4e   : > { %v498_v45 = vadd.f32 1e-05, %v490_v40  ;;  %v516_v47 = vmul.f32 %v840_v44, %v508_v39  ;;  %v451_v48 = vadd.f32 %v450_v42, %v449_v43  ;;  %v481_v49 = vmul.f32 %v465_v46, %v465_v46 }
  0x50   : > { %845 = vrsqrt.f32 %v498_v45  ;;  %562 = vperm.xlu0 %831, %v516_v47   ;;  %v473_v52 = vmul.f32 0.001953125, %v451_v48  ;;  %v532_v0 = vmul.f32 %v516_v47, %v1112_v58  ;;  %v531_v58 = vmul.f32 %v1206_v5, %v1051_v10  ;;  %v525_v10 = vld [vmem:[%s1343_s4 + $0x10] sm:$0xff] }
  0x51   : > { %v541_v19 = vsub.f32 %v525_v10, %v533_v15  ;;  %v549_v45 = vld [vmem:[%s1294_s9 + $0x10] sm:$0xff] }
  0x52   : > { %v489_v54 = vsub.f32 %v473_v52, %v481_v49  ;;  %v540_v4 = vsub.f32 %v524_v2, %v532_v0  ;;  %v539_v16 = vsub.f32 %v523_v11, %v531_v58  ;;  %v554_v49 = vld [vmem:[%s1294_s9 + $0x38] sm:$0xff] }
  0x54   : > { %v842_v53 = vpop.eup %841  ;;  %v497_v56 = vadd.f32 1e-05, %v489_v54 }
  0x55   : > { %v520_v55 = vmul.f32 %v842_v53, %v512_v50 }
  0x56   : > { %847 = vrsqrt.f32 %v497_v56  ;;  %v551_v56 = vld [vmem:[%s1294_s9 + $0x20] sm:$0xff] }
  0x57   : > { %582 = vperm.xlu1 %832, %v520_v55   ;;  %v536_v32 = vmul.f32 %v520_v55, %v1150_v23  ;;  %v530_v23 = vld [vmem:[%s1343_s4 + $0x38] sm:$0xff] }
  0x58   : > { %v844_v61 = vpop.eup %843 }
  0x59   : > { %v519_v62 = vmul.f32 %v844_v61, %v511_v60  ;;  %v544_v5 = vsub.f32 %v528_v14, %v536_v32 }
  0x5b   : > { %577 = vperm.xlu0 %831, %v519_v62   ;;  %v535_v20 = vmul.f32 %v519_v62, %v1192_v59 }
  0x5d   : > { %v846_v1 = vpop.eup %845  ;;  %v543_v21 = vsub.f32 %v527_v57, %v535_v20 }
  0x5e   : > { %v522_v3 = vmul.f32 %v846_v1, %v514_v63 }
  0x60   : > { %592 = vperm.xlu1 %832, %v522_v3   ;;  %v538_v17 = vmul.f32 %v522_v3, %v1225_v18  ;;  %v529_v18 = vld [vmem:[%s1343_s4 + $0x30] sm:$0xff] }
  0x62   : > { %v546_v51 = vsub.f32 %v530_v23, %v538_v17 }
  0x63   : > { %v848_v9 = vpop.eup %847 }
  0x64   : > { %610 = vperm.xlu1 %832, %v540_v4   ;;  %v521_v13 = vmul.f32 %v848_v9, %v513_v8  ;;  %v553_v4 = vld [vmem:[%s1294_s9 + $0x30] sm:$0xff] }
  0x66   : > { %587 = vperm.xlu0 %831, %v521_v13   ;;  %v537_v22 = vmul.f32 %v521_v13, %v465_v46 }
  0x68   : > { %620 = vperm.xlu1 %832, %v542_v12   ;;  %v545_v24 = vsub.f32 %v529_v18, %v537_v22 }
  0x6a   : > { %605 = vperm.xlu0 %831, %v539_v16  }
  0x6c   : > { %630 = vperm.xlu1 %832, %v544_v5  }
  0x6e   : > { %615 = vperm.xlu0 %831, %v541_v19  }
  0x70   : > { %640 = vperm.xlu1 %832, %v546_v51  }
  0x72   : > { %625 = vperm.xlu0 %831, %v543_v21  }
  0x76   : > { %635 = vperm.xlu0 %831, %v545_v24  }
  0xc2   : > { %v568_v25 = vpop.permute.xlu1 %567 }
  0xc3   : > { %v558_v59 = vpop.permute.xlu0 %557  ;;  %v597_v54 = vmul.f32 %v568_v25, %v549_v45 }
  0xc4   : > { %v595_v44 = vmul.f32 %v558_v59, %v547_v37 }
  0xc6   : > { %v573_v26 = vpop.permute.xlu1 %572 }
  0xc7   : > { %v598_v38 = vmul.f32 %v573_v26, %v550_v34 }
  0xcb   : > { %v563_v28 = vpop.permute.xlu0 %562 }
  0xcc   : > { %v596_v33 = vmul.f32 %v563_v28, %v548_v29 }
  0xd2   : > { %v583_v27 = vpop.permute.xlu1 %582 }
  0xd3   : > { %v600_v46 = vmul.f32 %v583_v27, %v552_v41 }
  0xd6   : > { %v578_v31 = vpop.permute.xlu0 %577 }
  0xd7   : > { %v599_v2 = vmul.f32 %v578_v31, %v551_v56 }
  0xdb   : > { %v593_v30 = vpop.permute.xlu1 %592 }
  0xdc   : > { %v602_v60 = vmul.f32 %v593_v30, %v554_v49 }
  0xdf   : > { %v611_v35 = vpop.permute.xlu1 %610 }
  0xe0   : > { %v644_v36 = vadd.f32 %v611_v35, %v596_v33 }
  0xe1   : > { %v588_v39 = vpop.permute.xlu0 %587 }
  0xe2   : > { %v652_v40 = vmax.f32 %v644_v36, 0.0  ;;  %v601_v58 = vmul.f32 %v588_v39, %v553_v4 }
  0xe3   : > { %v621_v42 = vpop.permute.xlu1 %620 }
  0xe4   : > { %660 = vst [vmem:[%s1300_s18 + $0x8] sm:$0xff] %v652_v40  ;;  %v646_v43 = vadd.f32 %v621_v42, %v598_v38 }
  0xe5   : > { %v606_v47 = vpop.permute.xlu0 %605 }
  0xe6   : > { %v654_v48 = vmax.f32 %v646_v43, 0.0  ;;  %v643_v50 = vadd.f32 %v606_v47, %v595_v44 }
  0xe7   : > { %v631_v52 = vpop.permute.xlu1 %630 }
  0xe8   : > { %662 = vst [vmem:[%s1300_s18 + $0x18] sm:$0xff] %v654_v48  ;;  %v648_v53 = vadd.f32 %v631_v52, %v600_v46  ;;  %v651_v55 = vmax.f32 %v643_v50, 0.0 }
  0xe9   : > { %v616_v61 = vpop.permute.xlu0 %615 }
  0xea   : > { %v656_v62 = vmax.f32 %v648_v53, 0.0  ;;  %659 = vst [vmem:[%s1300_s18] sm:$0xff] %v651_v55  ;;  %v645_v63 = vadd.f32 %v616_v61, %v597_v54 }
  0xeb   : > { %v641_v0 = vpop.permute.xlu1 %640  ;;  %v720_v14 = vld [vmem:[%s1300_s18 + $0x8] sm:$0xff] (%p934_p5) }
  0xec   : > { %664 = vst [vmem:[%s1300_s18 + $0x28] sm:$0xff] %v656_v62  ;;  %v650_v1 = vadd.f32 %v641_v0, %v602_v60  ;;  %v653_v3 = vmax.f32 %v645_v63, 0.0  ;;  %721 = vst [vmem:[%s675_s13 + $0x20] sm:$0xff] (%p934_p5), %v720_v14 }
  0xed   : > { %v626_v6 = vpop.permute.xlu0 %625 }
  0xee   : > { %v658_v7 = vmax.f32 %v650_v1, 0.0  ;;  %661 = vst [vmem:[%s1300_s18 + $0x10] sm:$0xff] %v653_v3  ;;  %v647_v8 = vadd.f32 %v626_v6, %v599_v2 }
  0xef   : > { %v724_v16 = vld [vmem:[%s1300_s18 + $0x18] sm:$0xff] (%p934_p5) }
  0xf0   : > { %666 = vst [vmem:[%s1300_s18 + $0x38] sm:$0xff] %v658_v7  ;;  %v655_v9 = vmax.f32 %v647_v8, 0.0  ;;  %725 = vst [vmem:[%s675_s13 + $0x60] sm:$0xff] (%p934_p5), %v724_v16 }
  0xf1   : > { %v636_v11 = vpop.permute.xlu0 %635  ;;  %v718_v13 = vld [vmem:[%s1300_s18] sm:$0xff] (%p934_p5) }
  0xf2   : > { %663 = vst [vmem:[%s1300_s18 + $0x20] sm:$0xff] %v655_v9  ;;  %v649_v12 = vadd.f32 %v636_v11, %v601_v58  ;;  %673 = sbr.rel (!%p934_p5) target bundleno = 255 (0xff), region = 82  ;;  %719 = vst [vmem:[%s675_s13] sm:$0xff] (%p934_p5), %v718_v13 }
  0xf3   : > { %v728_v5 = vld [vmem:[%s1300_s18 + $0x28] sm:$0xff] (%p934_p5) }
  0xf4   : > { %v657_v32 = vmax.f32 %v649_v12, 0.0  ;;  %729 = vst [vmem:[%s675_s13 + $0xa0] sm:$0xff] (%p934_p5), %v728_v5 }
  0xf5   : > { %v722_v15 = vld [vmem:[%s1300_s18 + $0x10] sm:$0xff] (%p934_p5) }
  0xf6   : > { %665 = vst [vmem:[%s1300_s18 + $0x30] sm:$0xff] %v657_v32  ;;  %723 = vst [vmem:[%s675_s13 + $0x40] sm:$0xff] (%p934_p5), %v722_v15 }
  0xf7   : > { %v732_v23 = vld [vmem:[%s1300_s18 + $0x38] sm:$0xff] }
  0xf8   : > { %733 = vst [vmem:[%s675_s13 + $0xe0] sm:$0xff] %v732_v23 }
  0xf9   : > { %v726_v10 = vld [vmem:[%s1300_s18 + $0x20] sm:$0xff] }
  0xfa   : > { %727 = vst [vmem:[%s675_s13 + $0x80] sm:$0xff] %v726_v10 }
  0xfd   : > { %v730_v17 = vld [vmem:[%s1300_s18 + $0x30] sm:$0xff] }
  0xfe   : > { %731 = vst [vmem:[%s675_s13 + $0xc0] sm:$0xff] %v730_v17 }
  0xff PF: > { %p12_p10 = scmp.ge.s32.totalorder %s921_s22, 6   ;;  %s1346_s18 = smov %s867_s19 }
 0x100   : > { %s1347_s19 = smov %s932_s25  ;;  %s1348_s20 = smov %s921_s22 }
 0x101   :  { %14 = sbr.rel (!%p12_p10) target bundleno = 2 (0x2), region = 151 }

// kernel: convembed_forward.6
= control target key start
LH: loop header
LB: loop body
LE: loop exit
PB: predicated region body
PF: predicated region fallthrough
CT: control target
= control target key end

     0   :  { %vm92_vm0 = vcmask 1046528   ;;  %s509_s0 = inlined_call_operand.vmem [shape: f32[9,9,128], index: 0, kind: input, shape index: {}]   ;;  %s510_s1 = inlined_call_operand.vmem [shape: f32[9,9,128], index: 1, kind: input, shape index: {}]   ;;  %s511_s2 = inlined_call_operand.vmem [shape: f32[9,9,128], index: 2, kind: input, shape index: {}]   ;;  %s512_s3 = inlined_call_operand.vmem [shape: f32[9,9,128], index: 3, kind: input, shape index: {}]   ;;  %s513_s4 = inlined_call_operand.vmem [shape: f32[8,8,128], index: 4, kind: output, shape index: {}]  }
   0x1   :  { %v17_v0 = vld [vmem:[%s509_s0] sm:$0xff]  ;;  %v18_v1 = vld [vmem:[%s509_s0 + $0x8] sm:$0x1]  ;;  %v281_v2 = vld [vmem:[%s509_s0 + $0x10] sm:$0xff] }
   0x2   :  { %v20_v3 = vld [vmem:[%s509_s0 + $0x18] sm:$0x1]  ;;  %v35_v4 = vld [vmem:[%s510_s1] sm:$0xff]  ;;  %v292_v5 = vld [vmem:[%s510_s1 + $0x10] sm:$0xff]  ;;  %v93_v6 = vrot.slane %v17_v0, 1  ;;  %v94_v7 = vrot.slane %v18_v1, 1 }
   0x3   :  { %v44_v8 = vld [vmem:[%s511_s2] sm:$0xff]  ;;  %v45_v9 = vld [vmem:[%s511_s2 + $0x8] sm:$0x1]  ;;  %v46_v10 = vld [vmem:[%s511_s2 + $0x10] sm:$0xff]  ;;  %v68_v11 = vmax.f32 %v17_v0, %v35_v4  ;;  %v69_v12 = vmax.f32 %v281_v2, %v292_v5  ;;  %v96_v13 = vrot.slane %v281_v2, 1  ;;  %v97_v14 = vrot.slane %v20_v3, 1 }
   0x4   :  { %v60_v15 = vld [vmem:[%s512_s3] sm:$0xff]  ;;  %v95_v16 = vsel %vm92_vm0, %v93_v6, %v94_v7  ;;  %v165_v17 = vrot.slane %v44_v8, 1  ;;  %v166_v18 = vrot.slane %v45_v9, 1  ;;  %v168_v19 = vrot.slane %v46_v10, 1  ;;  %v22_v23 = vld [vmem:[%s509_s0 + $0x28] sm:$0x1] }
   0x5   :  { %v21_v20 = vld [vmem:[%s509_s0 + $0x20] sm:$0xff]  ;;  %v314_v21 = vsel %vm92_vm0, %v96_v13, %v97_v14  ;;  %v125_v22 = vmax.f32 %v68_v11, %v95_v16  ;;  %v47_v25 = vld [vmem:[%s511_s2 + $0x18] sm:$0x1]  ;;  %v61_v27 = vld [vmem:[%s512_s3 + $0x10] sm:$0xff]  ;;  %v100_v31 = vrot.slane %v22_v23, 1 }
   0x6   :  { %v322_v24 = vld [vmem:[%s510_s1 + $0x20] sm:$0xff]  ;;  %v99_v26 = vrot.slane %v21_v20, 1  ;;  %v126_v28 = vmax.f32 %v69_v12, %v314_v21  ;;  %v23_v32 = vld [vmem:[%s509_s0 + $0x30] sm:$0xff]  ;;  %v167_v34 = vsel %vm92_vm0, %v165_v17, %v166_v18  ;;  %v169_v35 = vrot.slane %v47_v25, 1  ;;  %v24_v37 = vld [vmem:[%s509_s0 + $0x38] sm:$0x1] }
   0x7   :  { %v48_v29 = vld [vmem:[%s511_s2 + $0x20] sm:$0xff]  ;;  %v70_v30 = vmax.f32 %v21_v20, %v322_v24  ;;  %v133_v33 = vmax.f32 %v125_v22, %v44_v8  ;;  %v345_v38 = vld [vmem:[%s510_s1 + $0x30] sm:$0xff]  ;;  %v49_v42 = vld [vmem:[%s511_s2 + $0x28] sm:$0x1]  ;;  %v102_v44 = vrot.slane %v23_v32, 1  ;;  %v103_v49 = vrot.slane %v24_v37, 1 }
   0x8   :  { %v171_v36 = vrot.slane %v48_v29, 1  ;;  %v50_v39 = vld [vmem:[%s511_s2 + $0x30] sm:$0xff]  ;;  %v134_v40 = vmax.f32 %v126_v28, %v46_v10  ;;  %v101_v41 = vsel %vm92_vm0, %v99_v26, %v100_v31  ;;  %v71_v43 = vmax.f32 %v23_v32, %v345_v38  ;;  %v358_v45 = vld [vmem:[%s509_s0 + $0x40] sm:$0xff]  ;;  %v26_v50 = vld [vmem:[%s509_s0 + $0x48] sm:$0x1] }
   0x9   :  { %v141_v46 = vmax.f32 %v133_v33, %v60_v15  ;;  %v127_v47 = vmax.f32 %v70_v30, %v101_v41  ;;  %v170_v48 = vsel %vm92_vm0, %v168_v19, %v169_v35  ;;  %v367_v51 = vld [vmem:[%s510_s1 + $0x40] sm:$0xff]  ;;  %v172_v54 = vrot.slane %v49_v42, 1  ;;  %v51_v56 = vld [vmem:[%s511_s2 + $0x38] sm:$0x1]  ;;  %v385_v63 = vld [vmem:[%s509_s0 + $0x50] sm:$0xff] }
   0xa   :  { %v142_v52 = vmax.f32 %v134_v40, %v61_v27  ;;  %v62_v53 = vld [vmem:[%s512_s3 + $0x20] sm:$0xff]  ;;  %v174_v55 = vrot.slane %v50_v39, 1  ;;  %v72_v58 = vmax.f32 %v358_v45, %v367_v51  ;;  %v104_v61 = vsel %vm92_vm0, %v102_v44, %v103_v49  ;;  %v390_v0 = vld [vmem:[%s510_s1 + $0x50] sm:$0xff]  ;;  %v28_v12 = vld [vmem:[%s509_s0 + $0x58] sm:$0x1] }
   0xb   :  { %v52_v57 = vld [vmem:[%s511_s2 + $0x40] sm:$0xff]  ;;  %v197_v59 = vmax.f32 %v141_v46, %v167_v34  ;;  %v135_v60 = vmax.f32 %v127_v47, %v48_v29  ;;  %v105_v62 = vrot.slane %v358_v45, 1  ;;  %v128_v3 = vmax.f32 %v71_v43, %v104_v61  ;;  %v63_v9 = vld [vmem:[%s512_s3 + $0x30] sm:$0xff]  ;;  %v53_v16 = vld [vmem:[%s511_s2 + $0x48] sm:$0x1] }
   0xc   :  { %v198_v1 = vmax.f32 %v142_v52, %v170_v48  ;;  %v173_v4 = vsel %vm92_vm0, %v171_v36, %v172_v54  ;;  %v106_v6 = vrot.slane %v26_v50, 1  ;;  %v175_v10 = vrot.slane %v51_v56, 1  ;;  %v64_v26 = vld [vmem:[%s512_s3 + $0x40] sm:$0xff]  ;;  %v55_v37 = vld [vmem:[%s511_s2 + $0x58] sm:$0x1]  ;;  %v31_v44 = vld [vmem:[%s509_s0 + $0x70] sm:$0xff] }
   0xd   :  { %v205_v7 = vmax.f32 %v197_v59, %v281_v2  ;;  %v143_v8 = vmax.f32 %v135_v60, %v62_v53  ;;  %v177_v11 = vrot.slane %v52_v57, 1  ;;  %v136_v14 = vmax.f32 %v128_v3, %v50_v39  ;;  %v29_v33 = vld [vmem:[%s509_s0 + $0x60] sm:$0xff]  ;;  %v42_v46 = vld [vmem:[%s510_s1 + $0x70] sm:$0xff]  ;;  %v32_v56 = vld [vmem:[%s509_s0 + $0x78] sm:$0x1] }
   0xe   :  { %v206_v13 = vmax.f32 %v198_v1, %v21_v20  ;;  %v107_v15 = vsel %vm92_vm0, %v105_v62, %v106_v6  ;;  %v73_v2 = vmax.f32 %v385_v63, %v390_v0  ;;  %v176_v22 = vsel %vm92_vm0, %v174_v55, %v175_v10  ;;  %v54_v20 = vld [vmem:[%s511_s2 + $0x50] sm:$0xff]  ;;  %v426_v34 = vld [vmem:[%s510_s1 + $0x60] sm:$0xff] }
   0xf   :  { %v213_v17 = vmax.f32 %v205_v7, %v292_v5  ;;  %v199_v18 = vmax.f32 %v143_v8, %v173_v4  ;;  %v129_v19 = vmax.f32 %v72_v58, %v107_v15  ;;  %v144_v25 = vmax.f32 %v136_v14, %v63_v9  ;;  %v65_v47 = vld [vmem:[%s512_s3 + $0x50] sm:$0xff]  ;;  %v66_v7 = vld [vmem:[%s512_s3 + $0x60] sm:$0xff] }
  0x10   :  { %v214_v23 = vmax.f32 %v206_v13, %v322_v24  ;;  %v108_v27 = vrot.slane %v385_v63, 1  ;;  %v109_v28 = vrot.slane %v28_v12, 1  ;;  %v178_v31 = vrot.slane %v53_v16, 1  ;;  %v30_v24 = vld [vmem:[%s509_s0 + $0x68] sm:$0x1]  ;;  %v58_v4 = vld [vmem:[%s511_s2 + $0x70] sm:$0xff] }
  0x11   :  { %v227_v5 = vmax.f32 %v213_v17, %v314_v21  ;;  %v207_v29 = vmax.f32 %v199_v18, %v23_v32  ;;  %v137_v30 = vmax.f32 %v129_v19, %v52_v57  ;;  %v200_v36 = vmax.f32 %v144_v25, %v176_v22  ;;  %v33_v25 = vld [vmem:[%s509_s0 + $0x80] sm:$0xff] }
  0x12   :  { %v228_v35 = vmax.f32 %v214_v23, %v101_v41  ;;  %v110_v21 = vsel %vm92_vm0, %v108_v27, %v109_v28  ;;  %v180_v32 = vrot.slane %v54_v20, 1  ;;  %v179_v43 = vsel %vm92_vm0, %v177_v11, %v178_v31  ;;  %v56_v41 = vld [vmem:[%s511_s2 + $0x60] sm:$0xff] }
  0x13   :  { %235 = vst [vmem:[%s513_s4] sm:$0xff] %v227_v5  ;;  %v215_v39 = vmax.f32 %v207_v29, %v345_v38  ;;  %v145_v40 = vmax.f32 %v137_v30, %v64_v26  ;;  %v130_v42 = vmax.f32 %v73_v2, %v110_v21  ;;  %v208_v38 = vmax.f32 %v200_v36, %v358_v45  ;;  %v57_v45 = vld [vmem:[%s511_s2 + $0x68] sm:$0x1] }
  0x14   :  { %236 = vst [vmem:[%s513_s4 + $0x8] sm:$0xff] %v228_v35  ;;  %v74_v48 = vmax.f32 %v29_v33, %v426_v34  ;;  %v111_v49 = vrot.slane %v29_v33, 1  ;;  %v112_v50 = vrot.slane %v30_v24, 1  ;;  %v181_v55 = vrot.slane %v55_v37, 1  ;;  %v34_v26 = vld [vmem:[%s509_s0 + $0x88] sm:$0x1] }
  0x15   :  { %v229_v52 = vmax.f32 %v215_v39, %v104_v61  ;;  %v138_v53 = vmax.f32 %v130_v42, %v54_v20  ;;  %v201_v54 = vmax.f32 %v145_v40, %v179_v43  ;;  %v216_v57 = vmax.f32 %v208_v38, %v367_v51  ;;  %v59_v51 = vld [vmem:[%s511_s2 + $0x78] sm:$0x1] }
  0x16   :  { %v113_v58 = vsel %vm92_vm0, %v111_v49, %v112_v50  ;;  %v183_v59 = vrot.slane %v56_v41, 1  ;;  %v75_v60 = vmax.f32 %v31_v44, %v42_v46  ;;  %v182_v3 = vsel %vm92_vm0, %v180_v32, %v181_v55 }
  0x17   :  { %237 = vst [vmem:[%s513_s4 + $0x10] sm:$0xff] %v229_v52  ;;  %v146_v61 = vmax.f32 %v138_v53, %v65_v47  ;;  %v209_v62 = vmax.f32 %v201_v54, %v385_v63  ;;  %v131_v1 = vmax.f32 %v74_v48, %v113_v58  ;;  %v230_v6 = vmax.f32 %v216_v57, %v107_v15 }
  0x18   :  { %v114_v8 = vrot.slane %v31_v44, 1  ;;  %v115_v9 = vrot.slane %v32_v56, 1  ;;  %v184_v10 = vrot.slane %v57_v45, 1  ;;  %v186_v15 = vrot.slane %v58_v4, 1 }
  0x19   :  { %v217_v63 = vmax.f32 %v209_v62, %v390_v0  ;;  %v139_v11 = vmax.f32 %v131_v1, %v56_v41  ;;  %v202_v12 = vmax.f32 %v146_v61, %v182_v3  ;;  %238 = vst [vmem:[%s513_s4 + $0x18] sm:$0xff] %v230_v6  ;;  %v187_v16 = vrot.slane %v59_v51, 1  ;;  %v67_v0 = vld [vmem:[%s512_s3 + $0x70] sm:$0xff] }
  0x1a   :  { %v116_v13 = vsel %vm92_vm0, %v114_v8, %v115_v9  ;;  %v185_v14 = vsel %vm92_vm0, %v183_v59, %v184_v10  ;;  %v223_v30 = vrot.slane %v33_v25, 1  ;;  %v224_v31 = vrot.slane %v34_v26, 1 }
  0x1b   :  { %v231_v2 = vmax.f32 %v217_v63, %v110_v21  ;;  %v147_v17 = vmax.f32 %v139_v11, %v66_v7  ;;  %v210_v18 = vmax.f32 %v202_v12, %v29_v33  ;;  %v132_v19 = vmax.f32 %v75_v60, %v116_v13 }
  0x1c   :  { %v188_v27 = vsel %vm92_vm0, %v186_v15, %v187_v16  ;;  %v225_v21 = vsel %vm92_vm0, %v223_v30, %v224_v31 }
  0x1d   :  { %239 = vst [vmem:[%s513_s4 + $0x20] sm:$0xff] %v231_v2  ;;  %v218_v22 = vmax.f32 %v210_v18, %v426_v34  ;;  %v140_v20 = vmax.f32 %v132_v19, %v58_v4  ;;  %v203_v23 = vmax.f32 %v147_v17, %v185_v14  ;;  %v43_v34 = vld [vmem:[%s510_s1 + $0x80] sm:$0xff] }
  0x1f   :  { %v232_v28 = vmax.f32 %v218_v22, %v113_v58  ;;  %v148_v5 = vmax.f32 %v140_v20, %v67_v0  ;;  %v211_v29 = vmax.f32 %v203_v23, %v31_v44 }
  0x21   :  { %240 = vst [vmem:[%s513_s4 + $0x28] sm:$0xff] %v232_v28  ;;  %v219_v33 = vmax.f32 %v211_v29, %v42_v46  ;;  %v204_v24 = vmax.f32 %v148_v5, %v188_v27 }
  0x23   :  { %v233_v35 = vmax.f32 %v219_v33, %v116_v13  ;;  %v212_v36 = vmax.f32 %v204_v24, %v33_v25 }
  0x25   :  { %241 = vst [vmem:[%s513_s4 + $0x30] sm:$0xff] %v233_v35  ;;  %v220_v32 = vmax.f32 %v212_v36, %v43_v34 }
  0x27   :  { %v234_v37 = vmax.f32 %v220_v32, %v225_v21 }
  0x29   :  { %242 = vst [vmem:[%s513_s4 + $0x38] sm:$0xff] %v234_v37 }

// kernel: convembed_forward.7
= control target key start
LH: loop header
LB: loop body
LE: loop exit
PB: predicated region body
PF: predicated region fallthrough
CT: control target
= control target key end

     0   :  { %v1192_v3 = vmov 0   ;;  %vm186_vm0 = vcmask 523264   ;;  %vm711_vm1 = vcmask 261120   ;;  %s1849_s1 = inlined_call_operand.vmem [shape: f32[576,32], index: 1, kind: input, shape index: {}]   ;;  %s1850_s0 = inlined_call_operand.vmem [shape: f32[64,576], index: 0, kind: input, shape index: {}]   ;;  %s1851_s2 = inlined_call_operand.vmem [shape: f32[64,1], index: 2, kind: input, shape index: {}]   ;;  %s1852_s4 = inlined_call_operand.vmem [shape: f32[64,1], index: 4, kind: input, shape index: {}]   ;;  %s1853_s3 = inlined_call_operand.vmem [shape: f32[64,64], index: 3, kind: input, shape index: {}]   ;;  %s1854_s5 = inlined_call_operand.vmem [shape: f32[64,1], index: 5, kind: input, shape index: {}]   ;;  %s1855_s6 = inlined_call_operand.vmem [shape: f32[64,1], index: 6, kind: input, shape index: {}]   ;;  %s1856_s7 = inlined_call_operand.vmem [shape: f32[64,32], index: 7, kind: output, shape index: {}]  }
   0x1   :  { %v97_v0 = vld [vmem:[%s1849_s1 + $0xf8] sm:$0xff]  ;;  %v96_v2 = vld [vmem:[%s1849_s1 + $0xf0] sm:$0xff]  ;;  %1175 = vset.pattern.permute.xlu1 %v1192_v3  ;;  %1174 = vset.pattern.permute.xlu0 %v1192_v3  ;;  %v95_v7 = vld [vmem:[%s1849_s1 + $0xe8] sm:$0xff] }
   0x2   :  { %v81_v1 = vld [vmem:[%s1849_s1 + $0x78] sm:$0xff]  ;;  %973 = vmatprep.subr.mxu0 %v97_v0  ;;  %v80_v5 = vld [vmem:[%s1849_s1 + $0x70] sm:$0xff]  ;;  %v79_v9 = vld [vmem:[%s1849_s1 + $0x68] sm:$0xff] }
   0x3   :  { %v129_v4 = vld [vmem:[%s1849_s1 + $0x1f8] sm:$0xff]  ;;  %974 = vmatpush3.msra.mxu0 %v81_v1  ;;  %v128_v8 = vld [vmem:[%s1849_s1 + $0x1f0] sm:$0xff]  ;;  %v127_v11 = vld [vmem:[%s1849_s1 + $0x1e8] sm:$0xff] }
   0x4   :  { %v113_v6 = vld [vmem:[%s1849_s1 + $0x178] sm:$0xff]  ;;  %1029 = vmatprep.subr.mxu1 %v129_v4  ;;  %975 = vmatprep.subr.mxu0 %v96_v2  ;;  %v112_v10 = vld [vmem:[%s1849_s1 + $0x170] sm:$0xff]  ;;  %v94_v12 = vld [vmem:[%s1849_s1 + $0xe0] sm:$0xff] }
   0x5   :  { %1030 = vmatpush3.msra.mxu1 %v113_v6  ;;  %976 = vmatpush3.msra.mxu0 %v80_v5  ;;  %v111_v13 = vld [vmem:[%s1849_s1 + $0x168] sm:$0xff]  ;;  %v78_v14 = vld [vmem:[%s1849_s1 + $0x60] sm:$0xff]  ;;  %v93_v16 = vld [vmem:[%s1849_s1 + $0xd8] sm:$0xff] }
   0x6   :  { %1031 = vmatprep.subr.mxu1 %v128_v8  ;;  %977 = vmatprep.subr.mxu0 %v95_v7  ;;  %v126_v15 = vld [vmem:[%s1849_s1 + $0x1e0] sm:$0xff]  ;;  %v77_v18 = vld [vmem:[%s1849_s1 + $0x58] sm:$0xff]  ;;  %v92_v20 = vld [vmem:[%s1849_s1 + $0xd0] sm:$0xff] }
   0x7   :  { %1032 = vmatpush3.msra.mxu1 %v112_v10  ;;  %978 = vmatpush3.msra.mxu0 %v79_v9  ;;  %v110_v17 = vld [vmem:[%s1849_s1 + $0x160] sm:$0xff]  ;;  %v125_v19 = vld [vmem:[%s1849_s1 + $0x1d8] sm:$0xff]  ;;  %v76_v22 = vld [vmem:[%s1849_s1 + $0x50] sm:$0xff] }
   0x8   :  { %1033 = vmatprep.subr.mxu1 %v127_v11  ;;  %979 = vmatprep.subr.mxu0 %v94_v12  ;;  %v109_v21 = vld [vmem:[%s1849_s1 + $0x158] sm:$0xff]  ;;  %v124_v23 = vld [vmem:[%s1849_s1 + $0x1d0] sm:$0xff]  ;;  %v91_v24 = vld [vmem:[%s1849_s1 + $0xc8] sm:$0xff] }
   0x9   :  { %1034 = vmatpush3.msra.mxu1 %v111_v13  ;;  %980 = vmatpush3.msra.mxu0 %v78_v14  ;;  %v108_v25 = vld [vmem:[%s1849_s1 + $0x150] sm:$0xff]  ;;  %v75_v26 = vld [vmem:[%s1849_s1 + $0x48] sm:$0xff]  ;;  %v90_v28 = vld [vmem:[%s1849_s1 + $0xc0] sm:$0xff] }
   0xa   :  { %1035 = vmatprep.subr.mxu1 %v126_v15  ;;  %981 = vmatprep.subr.mxu0 %v93_v16  ;;  %v123_v27 = vld [vmem:[%s1849_s1 + $0x1c8] sm:$0xff]  ;;  %v74_v30 = vld [vmem:[%s1849_s1 + $0x40] sm:$0xff]  ;;  %v89_v32 = vld [vmem:[%s1849_s1 + $0xb8] sm:$0xff] }
   0xb   :  { %1036 = vmatpush3.msra.mxu1 %v110_v17  ;;  %982 = vmatpush3.msra.mxu0 %v77_v18  ;;  %v107_v29 = vld [vmem:[%s1849_s1 + $0x148] sm:$0xff]  ;;  %v122_v31 = vld [vmem:[%s1849_s1 + $0x1c0] sm:$0xff]  ;;  %v73_v34 = vld [vmem:[%s1849_s1 + $0x38] sm:$0xff] }
   0xc   :  { %1037 = vmatprep.subr.mxu1 %v125_v19  ;;  %983 = vmatprep.subr.mxu0 %v92_v20  ;;  %v106_v33 = vld [vmem:[%s1849_s1 + $0x140] sm:$0xff]  ;;  %v121_v35 = vld [vmem:[%s1849_s1 + $0x1b8] sm:$0xff]  ;;  %v88_v36 = vld [vmem:[%s1849_s1 + $0xb0] sm:$0xff] }
   0xd   :  { %1038 = vmatpush3.msra.mxu1 %v109_v21  ;;  %984 = vmatpush3.msra.mxu0 %v76_v22  ;;  %v105_v37 = vld [vmem:[%s1849_s1 + $0x138] sm:$0xff]  ;;  %v72_v38 = vld [vmem:[%s1849_s1 + $0x30] sm:$0xff]  ;;  %v87_v40 = vld [vmem:[%s1849_s1 + $0xa8] sm:$0xff] }
   0xe   :  { %1039 = vmatprep.subr.mxu1 %v124_v23  ;;  %985 = vmatprep.subr.mxu0 %v91_v24  ;;  %v120_v39 = vld [vmem:[%s1849_s1 + $0x1b0] sm:$0xff]  ;;  %v71_v42 = vld [vmem:[%s1849_s1 + $0x28] sm:$0xff]  ;;  %v86_v44 = vld [vmem:[%s1849_s1 + $0xa0] sm:$0xff] }
   0xf   :  { %1040 = vmatpush3.msra.mxu1 %v108_v25  ;;  %986 = vmatpush3.msra.mxu0 %v75_v26  ;;  %v104_v41 = vld [vmem:[%s1849_s1 + $0x130] sm:$0xff]  ;;  %v119_v43 = vld [vmem:[%s1849_s1 + $0x1a8] sm:$0xff]  ;;  %v70_v46 = vld [vmem:[%s1849_s1 + $0x20] sm:$0xff] }
  0x10   :  { %1041 = vmatprep.subr.mxu1 %v123_v27  ;;  %987 = vmatprep.subr.mxu0 %v90_v28  ;;  %v103_v45 = vld [vmem:[%s1849_s1 + $0x128] sm:$0xff]  ;;  %v118_v47 = vld [vmem:[%s1849_s1 + $0x1a0] sm:$0xff]  ;;  %v85_v48 = vld [vmem:[%s1849_s1 + $0x98] sm:$0xff] }
  0x11   :  { %1042 = vmatpush3.msra.mxu1 %v107_v29  ;;  %988 = vmatpush3.msra.mxu0 %v74_v30  ;;  %v102_v49 = vld [vmem:[%s1849_s1 + $0x120] sm:$0xff]  ;;  %v69_v50 = vld [vmem:[%s1849_s1 + $0x18] sm:$0xff]  ;;  %v84_v52 = vld [vmem:[%s1849_s1 + $0x90] sm:$0xff] }
  0x12   :  { %1043 = vmatprep.subr.mxu1 %v122_v31  ;;  %989 = vmatprep.subr.mxu0 %v89_v32  ;;  %v117_v51 = vld [vmem:[%s1849_s1 + $0x198] sm:$0xff]  ;;  %v68_v54 = vld [vmem:[%s1849_s1 + $0x10] sm:$0xff]  ;;  %v83_v56 = vld [vmem:[%s1849_s1 + $0x88] sm:$0xff] }
  0x13   :  { %1044 = vmatpush3.msra.mxu1 %v106_v33  ;;  %990 = vmatpush3.msra.mxu0 %v73_v34  ;;  %v101_v53 = vld [vmem:[%s1849_s1 + $0x118] sm:$0xff]  ;;  %v116_v55 = vld [vmem:[%s1849_s1 + $0x190] sm:$0xff]  ;;  %v67_v58 = vld [vmem:[%s1849_s1 + $0x8] sm:$0xff] }
  0x14   :  { %1045 = vmatprep.subr.mxu1 %v121_v35  ;;  %991 = vmatprep.subr.mxu0 %v88_v36  ;;  %v100_v57 = vld [vmem:[%s1849_s1 + $0x110] sm:$0xff]  ;;  %v115_v59 = vld [vmem:[%s1849_s1 + $0x188] sm:$0xff]  ;;  %v82_v60 = vld [vmem:[%s1849_s1 + $0x80] sm:$0xff] }
  0x15   :  { %1046 = vmatpush3.msra.mxu1 %v105_v37  ;;  %992 = vmatpush3.msra.mxu0 %v72_v38  ;;  %v27_v61 = vld [vmem:[%s1850_s0 + $0x8] sm:$0xff]  ;;  %v66_v62 = vld [vmem:[%s1849_s1] sm:$0xff]  ;;  %v29_v3 = vld [vmem:[%s1850_s0 + $0x18] sm:$0xff] }
  0x16   :  { %1047 = vmatprep.subr.mxu1 %v120_v39  ;;  %993 = vmatprep.subr.mxu0 %v87_v40  ;;  %v99_v63 = vld [vmem:[%s1849_s1 + $0x108] sm:$0xff]  ;;  %v26_v0 = vld [vmem:[%s1850_s0] sm:$0xff]  ;;  %v28_v4 = vld [vmem:[%s1850_s0 + $0x10] sm:$0xff] }
  0x17   :  { %1048 = vmatpush3.msra.mxu1 %v104_v41  ;;  %994 = vmatpush3.msra.mxu0 %v71_v42  ;;  %v114_v1 = vld [vmem:[%s1849_s1 + $0x180] sm:$0xff]  ;;  %v32_v5 = vld [vmem:[%s1850_s0 + $0x30] sm:$0xff]  ;;  %v137_v7 = vld [vmem:[%s1849_s1 + $0x238] sm:$0xff] }
  0x18   :  { %1049 = vmatprep.subr.mxu1 %v119_v43  ;;  %995 = vmatprep.subr.mxu0 %v86_v44  ;;  %v98_v2 = vld [vmem:[%s1849_s1 + $0x100] sm:$0xff]  ;;  %v31_v8 = vld [vmem:[%s1850_s0 + $0x28] sm:$0xff]  ;;  %v37_v9 = vld [vmem:[%s1850_s0 + $0x58] sm:$0xff] }
  0x19   :  { %1050 = vmatpush3.msra.mxu1 %v103_v45  ;;  %996 = vmatpush3.msra.mxu0 %v70_v46  ;;  %v34_v6 = vld [vmem:[%s1850_s0 + $0x40] sm:$0xff]  ;;  %v33_v10 = vld [vmem:[%s1850_s0 + $0x38] sm:$0xff]  ;;  %v136_v11 = vld [vmem:[%s1849_s1 + $0x230] sm:$0xff] }
  0x1a   :  { %1051 = vmatprep.subr.mxu1 %v118_v47  ;;  %997 = vmatprep.subr.mxu0 %v85_v48  ;;  %v39_v12 = vld [vmem:[%s1850_s0 + $0x68] sm:$0xff]  ;;  %v36_v13 = vld [vmem:[%s1850_s0 + $0x50] sm:$0xff]  ;;  %v42_v15 = vld [vmem:[%s1850_s0 + $0x80] sm:$0xff] }
  0x1b   :  { %1052 = vmatpush3.msra.mxu1 %v102_v49  ;;  %998 = vmatpush3.msra.mxu0 %v69_v50  ;;  %v135_v14 = vld [vmem:[%s1849_s1 + $0x228] sm:$0xff]  ;;  %v38_v16 = vld [vmem:[%s1850_s0 + $0x60] sm:$0xff]  ;;  %v44_v18 = vld [vmem:[%s1850_s0 + $0x90] sm:$0xff] }
  0x1c   :  { %1053 = vmatprep.subr.mxu1 %v117_v51  ;;  %999 = vmatprep.subr.mxu0 %v84_v52  ;;  %v134_v17 = vld [vmem:[%s1849_s1 + $0x220] sm:$0xff]  ;;  %v41_v19 = vld [vmem:[%s1850_s0 + $0x78] sm:$0xff]  ;;  %v47_v21 = vld [vmem:[%s1850_s0 + $0xa8] sm:$0xff] }
  0x1d   :  { %1054 = vmatpush3.msra.mxu1 %v101_v53  ;;  %1000 = vmatpush3.msra.mxu0 %v68_v54  ;;  %v133_v20 = vld [vmem:[%s1849_s1 + $0x218] sm:$0xff]  ;;  %v43_v22 = vld [vmem:[%s1850_s0 + $0x88] sm:$0xff]  ;;  %v132_v23 = vld [vmem:[%s1849_s1 + $0x210] sm:$0xff] }
  0x1e   :  { %1055 = vmatprep.subr.mxu1 %v116_v55  ;;  %1001 = vmatprep.subr.mxu0 %v83_v56  ;;  %v49_v24 = vld [vmem:[%s1850_s0 + $0xb8] sm:$0xff]  ;;  %v46_v25 = vld [vmem:[%s1850_s0 + $0xa0] sm:$0xff]  ;;  %v131_v26 = vld [vmem:[%s1849_s1 + $0x208] sm:$0xff] }
  0x1f   :  { %1056 = vmatpush3.msra.mxu1 %v100_v57  ;;  %1002 = vmatpush3.msra.mxu0 %v67_v58  ;;  %v52_v27 = vld [vmem:[%s1850_s0 + $0xd0] sm:$0xff]  ;;  %v130_v29 = vld [vmem:[%s1849_s1 + $0x200] sm:$0xff]  ;;  %v51_v31 = vld [vmem:[%s1850_s0 + $0xc8] sm:$0xff] }
  0x20   :  { %1057 = vmatprep.subr.mxu1 %v115_v59  ;;  %1003 = vmatprep.subr.mxu0 %v82_v60  ;;  %v48_v28 = vld [vmem:[%s1850_s0 + $0xb0] sm:$0xff]  ;;  %v54_v30 = vld [vmem:[%s1850_s0 + $0xe0] sm:$0xff]  ;;  %v143_v32 = vld [vmem:[%s1851_s2 + $0x28] sm:$0xff] }
  0x21   :  { %275 = vmatprep.mubr.f32.mxu0 %v27_v61  ;;  %1004 = vmatpush3.msra.mxu0 %v66_v62  ;;  %v57_v33 = vld [vmem:[%s1850_s0 + $0xf8] sm:$0xff]  ;;  %v59_v36 = vld [vmem:[%s1850_s0 + $0x108] sm:$0xff]  ;;  %v56_v37 = vld [vmem:[%s1850_s0 + $0xf0] sm:$0xff] }
  0x22   :  { %1058 = vmatpush3.msra.mxu1 %v99_v63  ;;  %276 = vmatmul.mubr.f32.vlgmr.msra.gmra.mxu0 %v26_v0  ;;  %v145_v34 = vld [vmem:[%s1851_s2 + $0x38] sm:$0xff]  ;;  %v142_v38 = vld [vmem:[%s1851_s2 + $0x20] sm:$0xff]  ;;  %v144_v40 = vld [vmem:[%s1851_s2 + $0x30] sm:$0xff] }
  0x23   :  { %1059 = vmatprep.subr.mxu1 %v114_v1  ;;  %380 = vmatprep.mubr.f32.mxu1 %v29_v3  ;;  %v53_v35 = vld [vmem:[%s1850_s0 + $0xd8] sm:$0xff]  ;;  %v62_v39 = vld [vmem:[%s1850_s0 + $0x120] sm:$0xff]  ;;  %v64_v42 = vld [vmem:[%s1850_s0 + $0x130] sm:$0xff] }
  0x24   :  { %1060 = vmatpush3.msra.mxu1 %v98_v2  ;;  %280 = vmatprep.mubr.f32.mxu0 %v32_v5  ;;  %v58_v41 = vld [vmem:[%s1850_s0 + $0x100] sm:$0xff]  ;;  %v61_v43 = vld [vmem:[%s1850_s0 + $0x118] sm:$0xff]  ;;  %v140_v44 = vld [vmem:[%s1851_s2 + $0x10] sm:$0xff] }
  0x25   :  { %381 = vmatmul.mubr.f32.vlgmr.msra.gmra.mxu1 %v28_v4  ;;  %1117 = vmatprep.subr.mxu0 %v137_v7  ;;  %v30_v45 = vld [vmem:[%s1850_s0 + $0x20] sm:$0xff]  ;;  %v141_v46 = vld [vmem:[%s1851_s2 + $0x18] sm:$0xff]  ;;  %v63_v47 = vld [vmem:[%s1850_s0 + $0x128] sm:$0xff] }
  0x26   :  { %385 = vmatprep.mubr.f32.mxu1 %v34_v6  ;;  %281 = vmatmul.mubr.f32.gmra.mxu0 %v31_v8  ;;  %v35_v48 = vld [vmem:[%s1850_s0 + $0x48] sm:$0xff]  ;;  %v138_v49 = vld [vmem:[%s1851_s2] sm:$0xff]  ;;  %v40_v50 = vld [vmem:[%s1850_s0 + $0x70] sm:$0xff] }
  0x27   :  { %285 = vmatprep.mubr.f32.mxu0 %v37_v9  ;;  %1118 = vmatpush3.msra.mxu0 %v137_v7  ;;  %v139_v51 = vld [vmem:[%s1851_s2 + $0x8] sm:$0xff]  ;;  %v45_v52 = vld [vmem:[%s1850_s0 + $0x98] sm:$0xff]  ;;  %v50_v54 = vld [vmem:[%s1850_s0 + $0xc0] sm:$0xff] }
  0x28   :  { %1119 = vmatprep.subr.mxu0 %v136_v11  ;;  %173 = vperm.xlu1 %1175, %v143_v32   ;;  %v535_v53 = vld [vmem:[%s1852_s4 + $0x8] sm:$0xff]  ;;  %v534_v55 = vld [vmem:[%s1852_s4] sm:$0xff]  ;;  %v537_v57 = vld [vmem:[%s1852_s4 + $0x18] sm:$0xff] }
  0x29   :  { %386 = vmatmul.mubr.f32.gmra.mxu1 %v33_v10  ;;  %1120 = vmatpush3.msra.mxu0 %v136_v11  ;;  %v55_v56 = vld [vmem:[%s1850_s0 + $0xe8] sm:$0xff]  ;;  %v60_v58 = vld [vmem:[%s1850_s0 + $0x110] sm:$0xff]  ;;  %v65_v60 = vld [vmem:[%s1850_s0 + $0x138] sm:$0xff] }
  0x2a   :  { %390 = vmatprep.mubr.f32.mxu1 %v39_v12  ;;  %286 = vmatmul.mubr.f32.gmra.mxu0 %v36_v13  ;;  %v536_v59 = vld [vmem:[%s1852_s4 + $0x10] sm:$0xff]  ;;  %v539_v61 = vld [vmem:[%s1852_s4 + $0x28] sm:$0xff]  ;;  %v538_v62 = vld [vmem:[%s1852_s4 + $0x20] sm:$0xff] }
  0x2b   :  { %1121 = vmatprep.subr.mxu0 %v135_v14  ;;  %290 = vmatprep.mubr.f32.mxu0 %v42_v15  ;;  %v541_v63 = vld [vmem:[%s1852_s4 + $0x38] sm:$0xff]  ;;  %v540_v0 = vld [vmem:[%s1852_s4 + $0x30] sm:$0xff]  ;;  %v526_v1 = vld [vmem:[%s1853_s3] sm:$0xff] }
  0x2c   :  { %1122 = vmatpush3.msra.mxu0 %v135_v14  ;;  %183 = vperm.xlu0 %1174, %v145_v34  }
  0x2d   :  { %391 = vmatmul.mubr.f32.gmra.mxu1 %v38_v16  ;;  %1123 = vmatprep.subr.mxu0 %v134_v17 }
  0x2e   :  { %395 = vmatprep.mubr.f32.mxu1 %v44_v18  ;;  %1124 = vmatpush3.msra.mxu0 %v134_v17 }
  0x2f   :  { %291 = vmatmul.mubr.f32.gmra.mxu0 %v41_v19  ;;  %1125 = vmatprep.subr.mxu0 %v133_v20 }
  0x30   :  { %295 = vmatprep.mubr.f32.mxu0 %v47_v21  ;;  %1126 = vmatpush3.msra.mxu0 %v133_v20 }
  0x31   :  { %396 = vmatmul.mubr.f32.gmra.mxu1 %v43_v22  ;;  %1127 = vmatprep.subr.mxu0 %v132_v23 }
  0x32   :  { %400 = vmatprep.mubr.f32.mxu1 %v49_v24  ;;  %1128 = vmatpush3.msra.mxu0 %v132_v23 }
  0x33   :  { %296 = vmatmul.mubr.f32.gmra.mxu0 %v46_v25  ;;  %1129 = vmatprep.subr.mxu0 %v131_v26 }
  0x34   :  { %300 = vmatprep.mubr.f32.mxu0 %v52_v27  ;;  %1130 = vmatpush3.msra.mxu0 %v131_v26 }
  0x35   :  { %401 = vmatmul.mubr.f32.gmra.mxu1 %v48_v28  ;;  %1131 = vmatprep.subr.mxu0 %v130_v29 }
  0x36   :  { %405 = vmatprep.mubr.f32.mxu1 %v54_v30  ;;  %1132 = vmatpush3.msra.mxu0 %v130_v29 }
  0x37   :  { %301 = vmatmul.mubr.f32.gmra.mxu0 %v51_v31  ;;  %168 = vperm.xlu1 %1175, %v142_v38  }
  0x38   :  { %305 = vmatprep.mubr.f32.mxu0 %v57_v33  ;;  %178 = vperm.xlu0 %1174, %v144_v40  }
  0x39   :  { %406 = vmatmul.mubr.f32.gmra.mxu1 %v53_v35 }
  0x3a   :  { %410 = vmatprep.mubr.f32.mxu1 %v59_v36 }
  0x3b   :  { %306 = vmatmul.mubr.f32.gmra.mxu0 %v56_v37  ;;  %158 = vperm.xlu1 %1175, %v140_v44  }
  0x3c   :  { %310 = vmatprep.mubr.f32.mxu0 %v62_v39  ;;  %163 = vperm.xlu0 %1174, %v141_v46  }
  0x3d   :  { %411 = vmatmul.mubr.f32.gmra.mxu1 %v58_v41 }
  0x3e   :  { %415 = vmatprep.mubr.f32.mxu1 %v64_v42 }
  0x3f   :  { %311 = vmatmul.mubr.f32.gmra.mxu0 %v61_v43  ;;  %148 = vperm.xlu1 %1175, %v138_v49  }
  0x40   :  { %1133 = vmatprep.mubr.msk.f32.mxu0 %vm186_vm0, %v30_v45  ;;  %153 = vperm.xlu0 %1174, %v139_v51  }
  0x41   :  { %416 = vmatmul.mubr.f32.gmra.mxu1 %v63_v47 }
  0x42   :  { %1161 = vmatprep.mubr.msk.f32.mxu1 %vm186_vm0, %v526_v1 }
  0x43   :  { %1134 = vmatmul.mubr.msk.f32.vlgmr.msra.gmra.mxu0 %vm186_vm0, %v35_v48  ;;  %549 = vperm.xlu1 %1175, %v535_v53  }
  0x44   :  { %1136 = vmatprep.mubr.msk.f32.mxu0 %vm186_vm0, %v40_v50  ;;  %544 = vperm.xlu0 %1174, %v534_v55  }
  0x47   :  { %1137 = vmatmul.mubr.msk.f32.gmra.mxu0 %vm186_vm0, %v45_v52  ;;  %559 = vperm.xlu1 %1175, %v537_v57  }
  0x48   :  { %1139 = vmatprep.mubr.msk.f32.mxu0 %vm186_vm0, %v50_v54  ;;  %554 = vperm.xlu0 %1174, %v536_v59  }
  0x4b   :  { %1140 = vmatmul.mubr.msk.f32.gmra.mxu0 %vm186_vm0, %v55_v56  ;;  %569 = vperm.xlu1 %1175, %v539_v61  }
  0x4c   :  { %1142 = vmatprep.mubr.msk.f32.mxu0 %vm186_vm0, %v60_v58  ;;  %564 = vperm.xlu0 %1174, %v538_v62  }
  0x4f   :  { %1143 = vmatmul.mubr.msk.f32.gmra.mxu0 %vm186_vm0, %v65_v60  ;;  %579 = vperm.xlu1 %1175, %v541_v63  }
  0x50   :  { %574 = vperm.xlu0 %1174, %v540_v0  }
  0xa3   :  { %v174_v33 = vpop.permute.xlu1 %173 }
  0xa7   :  { %v184_v31 = vpop.permute.xlu0 %183 }
  0xb2   :  { %v169_v42 = vpop.permute.xlu1 %168 }
  0xb3   :  { %v179_v37 = vpop.permute.xlu0 %178 }
  0xb6   :  { %v159_v57 = vpop.permute.xlu1 %158 }
  0xb7   :  { %v164_v51 = vpop.permute.xlu0 %163 }
  0xe2   :  { %v1629_v2 = vpop.f32.mrf.mxu0 }
  0xe4   :  { %v1631_v3 = vpop.f32.mrf.mxu0 }
  0xe5   :  { %v1633_v4 = vpop.f32.mrf.mxu1 }
  0xe6   :  { %v1008_v5 = vpop.f32.mrf.mxu0 }
  0xe7   :  { %v1635_v6 = vpop.f32.mrf.mxu1 }
  0xe8   :  { %v1009_v7 = vpop.f32.mrf.mxu0 }
  0xe9   :  { %v1637_v8 = vpop.f32.mrf.mxu1  ;;  %v1010_v0 = vadd.f32 %v1009_v7, %v1008_v5 }
  0xea   :  { %v1011_v9 = vpop.f32.mrf.mxu0 }
  0xeb   :  { %v1639_v10 = vpop.f32.mrf.mxu1 }
  0xec   :  { %v1012_v11 = vpop.f32.mrf.mxu0  ;;  %v1066_v7 = vadd.f32 %v1639_v10, %v1637_v8  ;;  %v529_v10 = vld [vmem:[%s1853_s3 + $0x18] sm:$0xff] }
  0xed   :  { %v1641_v12 = vpop.f32.mrf.mxu1  ;;  %v1013_v58 = vadd.f32 %v1012_v11, %v1011_v9 }
  0xef   :  { %v1014_v13 = vpop.f32.mrf.mxu0  ;;  %v1068_v14 = vpop.f32.mrf.mxu1 }
  0xf0   :  { %v1069_v9 = vadd.f32 %v1068_v14, %v1641_v12 }
  0xf1   :  { %v1015_v15 = vpop.f32.mrf.mxu0  ;;  %v1070_v16 = vpop.f32.mrf.mxu1 }
  0xf2   :  { %v1016_v53 = vadd.f32 %v1015_v15, %v1014_v13  ;;  %v1007_v13 = vadd.f32 %v1631_v3, %v1629_v2  ;;  %v154_v15 = vpop.permute.xlu0 %153  ;;  %v1063_v2 = vadd.f32 %v1635_v6, %v1633_v4  ;;  %v527_v4 = vld [vmem:[%s1853_s3 + $0x8] sm:$0xff]  ;;  %v528_v6 = vld [vmem:[%s1853_s3 + $0x10] sm:$0xff] }
  0xf3   :  { %v1017_v17 = vpop.f32.mrf.mxu0  ;;  %v1071_v18 = vpop.f32.mrf.mxu1  ;;  %v283_v5 = vadd.f32 %v1010_v0, %v154_v15 }
  0xf5   :  { %v1018_v19 = vpop.f32.mrf.mxu0  ;;  %v1073_v20 = vpop.f32.mrf.mxu1  ;;  %v388_v12 = vadd.f32 %v1066_v7, %v283_v5 }
  0xf6   :  { %v1019_v48 = vadd.f32 %v1018_v19, %v1017_v17 }
  0xf7   :  { %v1020_v21 = vpop.f32.mrf.mxu0  ;;  %v1074_v22 = vpop.f32.mrf.mxu1 }
  0xf8   :  { %v298_v60 = vadd.f32 %v1019_v48, %v169_v42  ;;  %v1075_v61 = vadd.f32 %v1074_v22, %v1073_v20  ;;  %v149_v20 = vpop.permute.xlu1 %148 }
  0xf9   :  { %v1021_v23 = vpop.f32.mrf.mxu0  ;;  %v1076_v24 = vpop.f32.mrf.mxu1  ;;  %v278_v22 = vadd.f32 %v1007_v13, %v149_v20 }
  0xfa   :  { %v1022_v44 = vadd.f32 %v1021_v23, %v1020_v21  ;;  %v293_v21 = vadd.f32 %v1016_v53, %v164_v51  ;;  %v1072_v23 = vadd.f32 %v1071_v18, %v1070_v16 }
  0xfb   :  { %v1023_v25 = vpop.f32.mrf.mxu0  ;;  %v1077_v26 = vpop.f32.mrf.mxu1 }
  0xfc   :  { %v303_v54 = vadd.f32 %v1022_v44, %v174_v33  ;;  %v1078_v55 = vadd.f32 %v1077_v26, %v1076_v24  ;;  %v288_v24 = vadd.f32 %v1013_v58, %v159_v57  ;;  %v398_v16 = vadd.f32 %v1072_v23, %v293_v21  ;;  %v545_v33 = vpop.permute.xlu0 %544 }
  0xfd   :  { %v1024_v27 = vpop.f32.mrf.mxu0  ;;  %v1079_v28 = vpop.f32.mrf.mxu1 }
  0xfe   :  { %v1025_v41 = vadd.f32 %v1024_v27, %v1023_v25  ;;  %v408_v17 = vadd.f32 %v1078_v55, %v303_v54  ;;  %v403_v25 = vadd.f32 %v1075_v61, %v298_v60  ;;  %v393_v26 = vadd.f32 %v1069_v9, %v288_v24 }
  0xff   :  { %v1026_v29 = vpop.f32.mrf.mxu0  ;;  %v1080_v30 = vpop.f32.mrf.mxu1 }
 0x100   :  { %v308_v49 = vadd.f32 %v1025_v41, %v179_v37  ;;  %v1081_v50 = vadd.f32 %v1080_v30, %v1079_v28  ;;  %v383_v28 = vadd.f32 %v1063_v2, %v278_v22  ;;  %v531_v30 = vld [vmem:[%s1853_s3 + $0x28] sm:$0xff]  ;;  %v555_v37 = vpop.permute.xlu0 %554 }
 0x101   :  { %v1027_v32 = vpop.f32.mrf.mxu0  ;;  %v1082_v34 = vpop.f32.mrf.mxu1 }
 0x102   :  { %v1028_v38 = vadd.f32 %v1027_v32, %v1026_v29  ;;  %v413_v63 = vadd.f32 %v1081_v50, %v308_v49  ;;  %v530_v29 = vld [vmem:[%s1853_s3 + $0x20] sm:$0xff]  ;;  %v533_v32 = vld [vmem:[%s1853_s3 + $0x38] sm:$0xff] }
 0x103   :  { %v1135_v35 = vpop.f32.mrf.mxu0  ;;  %v1083_v39 = vpop.f32.mrf.mxu1 }
 0x104   :  { %v313_v45 = vadd.f32 %v1028_v38, %v184_v31  ;;  %v1084_v46 = vadd.f32 %v1083_v39, %v1082_v34  ;;  %v493_v27 = vadd.f32 %v1135_v35, %v388_v12  ;;  %v532_v31 = vld [vmem:[%s1853_s3 + $0x30] sm:$0xff]  ;;  %v550_v34 = vpop.permute.xlu1 %549 }
 0x105   :  { %v1643_v36 = vpop.f32.mrf.mxu0 }
 0x106   :  { %v418_v56 = vadd.f32 %v1084_v46, %v313_v45  ;;  %v488_v8 = vadd.f32 %v1643_v36, %v383_v28  ;;  %v565_v46 = vpop.permute.xlu0 %564 }
 0x107   :  { %v1138_v40 = vpop.f32.mrf.mxu0 }
 0x108   :  { %v503_v3 = vadd.f32 %v1138_v40, %v398_v16  ;;  %v560_v41 = vpop.permute.xlu1 %559 }
 0x109   :  { %v497_v43 = vpop.f32.mrf.mxu0 }
 0x10a   :  { %v498_v14 = vadd.f32 %v497_v43, %v393_v26  ;;  %v575_v57 = vpop.permute.xlu0 %574 }
 0x10b   :  { %v1141_v47 = vpop.f32.mrf.mxu0 }
 0x10c   :  { %v513_v11 = vadd.f32 %v1141_v47, %v408_v17  ;;  %v570_v50 = vpop.permute.xlu1 %569 }
 0x10d   :  { %v507_v52 = vpop.f32.mrf.mxu0 }
 0x10e   :  { %v508_v18 = vadd.f32 %v507_v52, %v403_v25 }
 0x10f   :  { %v1144_v59 = vpop.f32.mrf.mxu0 }
 0x110   :  { %v523_v62 = vadd.f32 %v1144_v59, %v418_v56  ;;  %v580_v60 = vpop.permute.xlu1 %579 }
 0x111   :  { %v517_v1 = vpop.f32.mrf.mxu0 }
 0x112   :  { %v518_v19 = vadd.f32 %v517_v1, %v413_v63  ;;  %1145 = vmatprep.subr.mxu1 %v523_v62 }
 0x113   :  { %1146 = vmatpush3.msra.mxu1 %v523_v62 }
 0x114   :  { %1147 = vmatprep.subr.mxu1 %v518_v19 }
 0x115   :  { %1148 = vmatpush3.msra.mxu1 %v518_v19 }
 0x116   :  { %1149 = vmatprep.subr.mxu1 %v513_v11 }
 0x117   :  { %1150 = vmatpush3.msra.mxu1 %v513_v11 }
 0x118   :  { %1151 = vmatprep.subr.mxu1 %v508_v18 }
 0x119   :  { %1152 = vmatpush3.msra.mxu1 %v508_v18 }
 0x11a   :  { %1153 = vmatprep.subr.mxu1 %v503_v3 }
 0x11b   :  { %1154 = vmatpush3.msra.mxu1 %v503_v3 }
 0x11c   :  { %1155 = vmatprep.subr.mxu1 %v498_v14 }
 0x11d   :  { %1156 = vmatpush3.msra.mxu1 %v498_v14 }
 0x11e   :  { %1157 = vmatprep.subr.mxu1 %v493_v27 }
 0x11f   :  { %1158 = vmatpush3.msra.mxu1 %v493_v27 }
 0x120   :  { %1159 = vmatprep.subr.mxu1 %v488_v8 }
 0x121   :  { %1160 = vmatpush3.msra.mxu1 %v488_v8 }
 0x122   :  { %1162 = vmatmul.mubr.msk.f32.vlgmr.msra.gmra.mxu1 %vm186_vm0, %v527_v4 }
 0x123   :  { %1164 = vmatprep.mubr.msk.f32.mxu1 %vm186_vm0, %v528_v6 }
 0x126   :  { %1165 = vmatmul.mubr.msk.f32.gmra.mxu1 %vm186_vm0, %v529_v10 }
 0x127   :  { %1167 = vmatprep.mubr.msk.f32.mxu1 %vm186_vm0, %v530_v29 }
 0x12a   :  { %1168 = vmatmul.mubr.msk.f32.gmra.mxu1 %vm186_vm0, %v531_v30 }
 0x12b   :  { %1170 = vmatprep.mubr.msk.f32.mxu1 %vm186_vm0, %v532_v31 }
 0x12e   :  { %1171 = vmatmul.mubr.msk.f32.gmra.mxu1 %vm186_vm0, %v533_v32 }
 0x1e2   :  { %v1163_v35 = vpop.f32.mrf.mxu1 }
 0x1e3   :  { %v1681_v36 = vadd.f32 %v1163_v35, %v550_v34 }
 0x1e4   :  { %v672_v38 = vpop.f32.mrf.mxu1 }
 0x1e5   :  { %v1683_v39 = vadd.f32 %v672_v38, %v545_v33  ;;  %v715_v40 = vsel %vm711_vm1, %v1681_v36, 0.0 }
 0x1e6   :  { %716 = vadd.xlane.f32.xlu1 %v715_v40  ;;  %v1166_v42 = vpop.f32.mrf.mxu1 }
 0x1e7   :  { %v1687_v43 = vadd.f32 %v1166_v42, %v560_v41  ;;  %v712_v44 = vsel %vm711_vm1, %v1683_v39, 0.0 }
 0x1e8   :  { %v682_v45 = vpop.f32.mrf.mxu1  ;;  %713 = vadd.xlane.f32.xlu0 %v712_v44 }
 0x1e9   :  { %v1691_v48 = vadd.f32 %v682_v45, %v555_v37  ;;  %v721_v49 = vsel %vm711_vm1, %v1687_v43, 0.0 }
 0x1ea   :  { %v1169_v47 = vpop.f32.mrf.mxu1 }
 0x1eb   :  { %v1697_v54 = vadd.f32 %v1169_v47, %v570_v50  ;;  %v718_v56 = vsel %vm711_vm1, %v1691_v48, 0.0 }
 0x1ec   :  { %v692_v51 = vpop.f32.mrf.mxu1  ;;  %722 = vadd.xlane.f32.xlu0 %v721_v49 }
 0x1ed   :  { %v1695_v52 = vadd.f32 %v692_v51, %v565_v46  ;;  %v727_v63 = vsel %vm711_vm1, %v1697_v54, 0.0 }
 0x1ee   :  { %v1172_v53 = vpop.f32.mrf.mxu1 }
 0x1ef   :  { %v724_v55 = vsel %vm711_vm1, %v1695_v52, 0.0  ;;  %v1705_v61 = vadd.f32 %v1172_v53, %v580_v60 }
 0x1f0   :  { %v702_v58 = vpop.f32.mrf.mxu1  ;;  %725 = vadd.xlane.f32.xlu1 %v724_v55  ;;  %719 = vadd.xlane.f32.xlu0 %v718_v56 }
 0x1f1   :  { %v1703_v59 = vadd.f32 %v702_v58, %v575_v57  ;;  %v733_v0 = vsel %vm711_vm1, %v1705_v61, 0.0 }
 0x1f3   :  { %v730_v62 = vsel %vm711_vm1, %v1703_v59, 0.0 }
 0x1f4   :  { %731 = vadd.xlane.f32.xlu1 %v730_v62  ;;  %728 = vadd.xlane.f32.xlu0 %v727_v63 }
 0x1f8   :  { %734 = vadd.xlane.f32.xlu0 %v733_v0 }
 0x26f   :  { %v717_v1 = vpop.xlane.xlu1 %716 }
 0x270   :  { %v1713_v21 = vmul.f32 0.03125, %v717_v1  ;;  %v810_v1 = vld [vmem:[%s1854_s5 + $0x8] sm:$0xff] }
 0x271   :  { %v714_v23 = vpop.xlane.xlu0 %713 }
 0x272   :  { %v746_v17 = vsub.f32 %v1681_v36, %v1713_v21  ;;  %v1717_v19 = vmul.f32 0.03125, %v714_v23 }
 0x274   :  { %v745_v13 = vsub.f32 %v1683_v39, %v1717_v19  ;;  %v754_v15 = vmul.f32 %v746_v17, %v746_v17 }
 0x275   :  { %v723_v24 = vpop.xlane.xlu0 %722 }
 0x276   :  { %v1721_v9 = vmul.f32 0.03125, %v723_v24  ;;  %v764_v11 = vsel %vm711_vm1, %v754_v15, 0.0  ;;  %v753_v25 = vmul.f32 %v745_v13, %v745_v13 }
 0x277   :  { %765 = vadd.xlane.f32.xlu0 %v764_v11  ;;  %v809_v11 = vld [vmem:[%s1854_s5] sm:$0xff] }
 0x278   :  { %v748_v20 = vsub.f32 %v1687_v43, %v1721_v9  ;;  %v761_v5 = vsel %vm711_vm1, %v753_v25, 0.0 }
 0x279   :  { %v726_v7 = vpop.xlane.xlu1 %725  ;;  %762 = vadd.xlane.f32.xlu1 %v761_v5  ;;  %v720_v16 = vpop.xlane.xlu0 %719 }
 0x27a   :  { %v1727_v18 = vmul.f32 0.03125, %v726_v7  ;;  %v1729_v22 = vmul.f32 0.03125, %v720_v16  ;;  %v756_v2 = vmul.f32 %v748_v20, %v748_v20 }
 0x27c   :  { %v749_v3 = vsub.f32 %v1695_v52, %v1727_v18  ;;  %v747_v26 = vsub.f32 %v1691_v48, %v1729_v22  ;;  %v770_v12 = vsel %vm711_vm1, %v756_v2, 0.0 }
 0x27d   :  { %v732_v14 = vpop.xlane.xlu1 %731  ;;  %771 = vadd.xlane.f32.xlu0 %v770_v12  ;;  %v729_v27 = vpop.xlane.xlu0 %728 }
 0x27e   :  { %v1736_v28 = vmul.f32 0.03125, %v732_v14  ;;  %v1738_v8 = vmul.f32 0.03125, %v729_v27  ;;  %v755_v4 = vmul.f32 %v747_v26, %v747_v26  ;;  %v757_v30 = vmul.f32 %v749_v3, %v749_v3  ;;  %v825_v3 = vld [vmem:[%s1855_s6] sm:$0xff]  ;;  %v812_v26 = vld [vmem:[%s1854_s5 + $0x18] sm:$0xff] }
 0x280   :  { %v751_v6 = vsub.f32 %v1703_v59, %v1736_v28  ;;  %v750_v10 = vsub.f32 %v1697_v54, %v1738_v8  ;;  %v767_v29 = vsel %vm711_vm1, %v755_v4, 0.0  ;;  %v773_v35 = vsel %vm711_vm1, %v757_v30, 0.0  ;;  %v811_v30 = vld [vmem:[%s1854_s5 + $0x10] sm:$0xff] }
 0x281   :  { %768 = vadd.xlane.f32.xlu1 %v767_v29  ;;  %v735_v31 = vpop.xlane.xlu0 %734  ;;  %v826_v29 = vld [vmem:[%s1855_s6 + $0x8] sm:$0xff] }
 0x282   :  { %v1745_v32 = vmul.f32 0.03125, %v735_v31  ;;  %v758_v33 = vmul.f32 %v750_v10, %v750_v10  ;;  %v759_v38 = vmul.f32 %v751_v6, %v751_v6 }
 0x284   :  { %v752_v34 = vsub.f32 %v1705_v61, %v1745_v32  ;;  %v776_v37 = vsel %vm711_vm1, %v758_v33, 0.0  ;;  %v779_v41 = vsel %vm711_vm1, %v759_v38, 0.0 }
 0x285   :  { %774 = vadd.xlane.f32.xlu1 %v773_v35  ;;  %777 = vadd.xlane.f32.xlu0 %v776_v37 }
 0x286   :  { %v760_v40 = vmul.f32 %v752_v34, %v752_v34  ;;  %v813_v34 = vld [vmem:[%s1854_s5 + $0x20] sm:$0xff] }
 0x288   :  { %v782_v42 = vsel %vm711_vm1, %v760_v40, 0.0  ;;  %v827_v40 = vld [vmem:[%s1855_s6 + $0x10] sm:$0xff] }
 0x289   :  { %780 = vadd.xlane.f32.xlu1 %v779_v41  ;;  %783 = vadd.xlane.f32.xlu0 %v782_v42  ;;  %v814_v41 = vld [vmem:[%s1854_s5 + $0x28] sm:$0xff] }
 0x300   :  { %v766_v44 = vpop.xlane.xlu0 %765 }
 0x301   :  { %v786_v45 = vmul.f32 0.03125, %v766_v44 }
 0x302   :  { %v763_v46 = vpop.xlane.xlu1 %762 }
 0x303   :  { %v794_v47 = vadd.f32 1e-05, %v786_v45  ;;  %v785_v49 = vmul.f32 0.03125, %v763_v46 }
 0x305   :  { %1176 = vrsqrt.f32 %v794_v47  ;;  %v793_v50 = vadd.f32 1e-05, %v785_v49  ;;  %v828_v47 = vld [vmem:[%s1855_s6 + $0x18] sm:$0xff] }
 0x306   :  { %v772_v51 = vpop.xlane.xlu0 %771 }
 0x307   :  { %1178 = vrsqrt.f32 %v793_v50  ;;  %v788_v53 = vmul.f32 0.03125, %v772_v51 }
 0x309   :  { %v796_v55 = vadd.f32 1e-05, %v788_v53 }
 0x30a   :  { %v769_v56 = vpop.xlane.xlu1 %768 }
 0x30b   :  { %1180 = vrsqrt.f32 %v796_v55  ;;  %v787_v57 = vmul.f32 0.03125, %v769_v56  ;;  %v816_v55 = vld [vmem:[%s1854_s5 + $0x38] sm:$0xff] }
 0x30d   :  { %v795_v58 = vadd.f32 1e-05, %v787_v57 }
 0x30e   :  { %v775_v60 = vpop.xlane.xlu1 %774  ;;  %v778_v62 = vpop.xlane.xlu0 %777 }
 0x30f   :  { %1182 = vrsqrt.f32 %v795_v58  ;;  %v789_v63 = vmul.f32 0.03125, %v775_v60  ;;  %v790_v0 = vmul.f32 0.03125, %v778_v62  ;;  %v830_v62 = vld [vmem:[%s1855_s6 + $0x28] sm:$0xff] }
 0x311   :  { %v797_v23 = vadd.f32 1e-05, %v789_v63  ;;  %v798_v17 = vadd.f32 1e-05, %v790_v0 }
 0x312   :  { %v1177_v13 = vpop.eup %1176  ;;  %v781_v15 = vpop.xlane.xlu1 %780 }
 0x313   :  { %v784_v24 = vpop.xlane.xlu0 %783  ;;  %1184 = vrsqrt.f32 %v797_v23  ;;  %v791_v25 = vmul.f32 0.03125, %v781_v15  ;;  %v818_v20 = vmul.f32 %v1177_v13, %v810_v1 }
 0x314   :  { %v1179_v5 = vpop.eup %1178  ;;  %v792_v7 = vmul.f32 0.03125, %v784_v24  ;;  %1186 = vrsqrt.f32 %v798_v17 }
 0x315   :  { %v799_v16 = vadd.f32 1e-05, %v791_v25  ;;  %856 = vperm.xlu0 %1174, %v818_v20   ;;  %v817_v2 = vmul.f32 %v1179_v5, %v809_v11  ;;  %v834_v10 = vmul.f32 %v818_v20, %v1713_v21 }
 0x316   :  { %v800_v27 = vadd.f32 1e-05, %v792_v7 }
 0x317   :  { %851 = vperm.xlu1 %1175, %v817_v2   ;;  %v833_v12 = vmul.f32 %v817_v2, %v1717_v19  ;;  %1188 = vrsqrt.f32 %v799_v16  ;;  %v842_v19 = vsub.f32 %v826_v29, %v834_v10 }
 0x318   :  { %v1181_v14 = vpop.eup %1180  ;;  %1190 = vrsqrt.f32 %v800_v27 }
 0x319   :  { %v841_v4 = vsub.f32 %v825_v3, %v833_v12  ;;  %v820_v6 = vmul.f32 %v1181_v14, %v812_v26 }
 0x31b   :  { %899 = vperm.xlu0 %1174, %v841_v4   ;;  %866 = vperm.xlu1 %1175, %v820_v6   ;;  %v836_v45 = vmul.f32 %v820_v6, %v1721_v9  ;;  %v829_v9 = vld [vmem:[%s1855_s6 + $0x20] sm:$0xff] }
 0x31c   :  { %v1183_v31 = vpop.eup %1182 }
 0x31d   :  { %v819_v33 = vmul.f32 %v1183_v31, %v811_v30  ;;  %v844_v50 = vsub.f32 %v828_v47, %v836_v45 }
 0x31f   :  { %904 = vperm.xlu1 %1175, %v842_v19   ;;  %v835_v37 = vmul.f32 %v819_v33, %v1729_v22  ;;  %v815_v22 = vld [vmem:[%s1854_s5 + $0x30] sm:$0xff] }
 0x320   :  { %v1185_v21 = vpop.eup %1184 }
 0x321   :  { %v821_v35 = vmul.f32 %v1185_v21, %v813_v34  ;;  %v1187_v38 = vpop.eup %1186  ;;  %v843_v42 = vsub.f32 %v827_v40, %v835_v37 }
 0x322   :  { %v822_v44 = vmul.f32 %v1187_v38, %v814_v41 }
 0x323   :  { %871 = vperm.xlu0 %1174, %v821_v35   ;;  %861 = vperm.xlu1 %1175, %v819_v33   ;;  %v837_v51 = vmul.f32 %v821_v35, %v1727_v18  ;;  %v831_v18 = vld [vmem:[%s1855_s6 + $0x30] sm:$0xff] }
 0x324   :  { %v1189_v46 = vpop.eup %1188  ;;  %v838_v60 = vmul.f32 %v822_v44, %v1738_v8 }
 0x325   :  { %v823_v49 = vmul.f32 %v1189_v46, %v815_v22  ;;  %v1191_v53 = vpop.eup %1190  ;;  %v845_v56 = vsub.f32 %v829_v9, %v837_v51 }
 0x326   :  { %v824_v57 = vmul.f32 %v1191_v53, %v816_v55  ;;  %v846_v0 = vsub.f32 %v830_v62, %v838_v60 }
 0x327   :  { %909 = vperm.xlu0 %1174, %v843_v42   ;;  %876 = vperm.xlu1 %1175, %v822_v44   ;;  %v839_v58 = vmul.f32 %v823_v49, %v1736_v28  ;;  %v832_v28 = vld [vmem:[%s1855_s6 + $0x38] sm:$0xff] }
 0x328   :  { %v840_v1 = vmul.f32 %v824_v57, %v1745_v32 }
 0x329   :  { %v847_v63 = vsub.f32 %v831_v18, %v839_v58 }
 0x32a   :  { %v848_v8 = vsub.f32 %v832_v28, %v840_v1 }
 0x32b   :  { %881 = vperm.xlu0 %1174, %v823_v49   ;;  %914 = vperm.xlu1 %1175, %v844_v50  }
 0x32f   :  { %919 = vperm.xlu0 %1174, %v845_v56   ;;  %886 = vperm.xlu1 %1175, %v824_v57  }
 0x333   :  { %929 = vperm.xlu0 %1174, %v847_v63   ;;  %924 = vperm.xlu1 %1175, %v846_v0  }
 0x337   :  { %934 = vperm.xlu1 %1175, %v848_v8  }
 0x390   :  { %v857_v23 = vpop.permute.xlu0 %856 }
 0x391   :  { %v890_v25 = vmul.f32 %v857_v23, %v1681_v36 }
 0x392   :  { %v852_v17 = vpop.permute.xlu1 %851 }
 0x393   :  { %v889_v13 = vmul.f32 %v852_v17, %v1683_v39 }
 0x396   :  { %v867_v15 = vpop.permute.xlu1 %866  ;;  %v900_v24 = vpop.permute.xlu0 %899 }
 0x397   :  { %v937_v11 = vadd.f32 %v900_v24, %v889_v13  ;;  %v892_v36 = vmul.f32 %v867_v15, %v1687_v43 }
 0x399   :  { %945 = vst.msk [vmem:[%s1856_s7] sm:$0xff] %vm711_vm1, %v937_v11 }
 0x39a   :  { %v905_v32 = vpop.permute.xlu1 %904 }
 0x39b   :  { %v938_v20 = vadd.f32 %v905_v32, %v890_v25 }
 0x39d   :  { %946 = vst.msk [vmem:[%s1856_s7 + $0x8] sm:$0xff] %vm711_vm1, %v938_v20 }
 0x39e   :  { %v862_v5 = vpop.permute.xlu1 %861  ;;  %v872_v7 = vpop.permute.xlu0 %871 }
 0x39f   :  { %v891_v39 = vmul.f32 %v862_v5, %v1691_v48  ;;  %v893_v27 = vmul.f32 %v872_v7, %v1695_v52 }
 0x3a2   :  { %v877_v16 = vpop.permute.xlu1 %876  ;;  %v910_v2 = vpop.permute.xlu0 %909 }
 0x3a3   :  { %v939_v3 = vadd.f32 %v910_v2, %v891_v39  ;;  %v894_v43 = vmul.f32 %v877_v16, %v1697_v54 }
 0x3a5   :  { %947 = vst.msk [vmem:[%s1856_s7 + $0x10] sm:$0xff] %vm711_vm1, %v939_v3 }
 0x3a6   :  { %v915_v26 = vpop.permute.xlu1 %914  ;;  %v882_v12 = vpop.permute.xlu0 %881 }
 0x3a7   :  { %v940_v14 = vadd.f32 %v915_v26, %v892_v36  ;;  %v895_v10 = vmul.f32 %v882_v12, %v1703_v59 }
 0x3a9   :  { %948 = vst.msk [vmem:[%s1856_s7 + $0x18] sm:$0xff] %vm711_vm1, %v940_v14 }
 0x3aa   :  { %v887_v48 = vpop.permute.xlu1 %886  ;;  %v920_v4 = vpop.permute.xlu0 %919 }
 0x3ab   :  { %v941_v6 = vadd.f32 %v920_v4, %v893_v27  ;;  %v896_v19 = vmul.f32 %v887_v48, %v1705_v61 }
 0x3ad   :  { %949 = vst.msk [vmem:[%s1856_s7 + $0x20] sm:$0xff] %vm711_vm1, %v941_v6 }
 0x3ae   :  { %v925_v29 = vpop.permute.xlu1 %924  ;;  %v930_v30 = vpop.permute.xlu0 %929 }
 0x3af   :  { %v942_v52 = vadd.f32 %v925_v29, %v894_v43  ;;  %v943_v31 = vadd.f32 %v930_v30, %v895_v10 }
 0x3b1   :  { %950 = vst.msk [vmem:[%s1856_s7 + $0x28] sm:$0xff] %vm711_vm1, %v942_v52  ;;  %951 = vst.msk [vmem:[%s1856_s7 + $0x30] sm:$0xff] %vm711_vm1, %v943_v31 }
 0x3b2   :  { %v935_v54 = vpop.permute.xlu1 %934 }
 0x3b3   :  { %v944_v59 = vadd.f32 %v935_v54, %v896_v19 }
 0x3b5   :  { %952 = vst.msk [vmem:[%s1856_s7 + $0x38] sm:$0xff] %vm711_vm1, %v944_v59 }

</bundles_post_ra>
